<compile_context>
chip_gen: v7x
topology: tpu7x:2x2x1
jax: 0.10.0
libtpu: 0.0.40
codegen_flags: <defaults>
</compile_context>

<pallas_src>
import math

import jax
import jax.numpy as jnp
from jax.experimental import pallas as pl
from jax.experimental.pallas import tpu as pltpu

# ---- small hyperparameters consistent with the module's constructor ----
VOCAB = 100
EMB = 32           # embedding_dim
HID = 32           # hidden_dim (module is only self-consistent when EMB == HID)
NCLASS = 4         # num_class
DFF = 64           # dim_feedforward
NHEAD = 2          # num_head
NLAYERS = 2        # num_layers
MAXLEN = 128       # max_len
DH = HID // NHEAD
EPS = 1e-5
NEG_INF = -1e30    # additive key-padding mask value (acts like -inf in softmax)
MM_DTYPE = jnp.bfloat16   # matmul-input dtype (full-rate MXU path on v6e/v7x)


def _layer_norm(x, g, b):
    mu = jnp.mean(x, axis=-1, keepdims=True)
    var = jnp.mean((x - mu) * (x - mu), axis=-1, keepdims=True)
    return (x - mu) * jax.lax.rsqrt(var + EPS) * g + b


# ----------------------------------------------------------------------------
# Kernel
# ----------------------------------------------------------------------------
def _make_kernel(TB, S):
    scale = 1.0 / math.sqrt(DH)

    def kernel(x_ref, mask_ref, wqkv_ref, bqkv_ref, wo_ref,
               w1_ref, b1_ref, w2_ref, vecs_ref, out_ref):
        # fold the TB batch elements into the matmul M dimension
        x = x_ref[...].reshape(TB * S, HID)          # f32 activations
        add_mask = mask_ref[...]                     # (TB, 1, S) additive key mask

        for l in range(NLAYERS):                     # static unrolled layer loop
            vecs = vecs_ref[l]                       # (6, HID) packed small params
            bo, b2 = vecs[0:1], vecs[1:2]
            ln1g, ln1b = vecs[2:3], vecs[3:4]
            ln2g, ln2b = vecs[4:5], vecs[5:6]

            # ---- fused QKV projection: one (TB*S, H) @ (H, 3H) matmul -------
            qkv = jnp.dot(x.astype(MM_DTYPE), wqkv_ref[l],
                          preferred_element_type=jnp.float32) + bqkv_ref[l]
            qkv = qkv.reshape(TB, S, 3 * HID)

            # ---- multi-head attention, batched over the TB batch tile ------
            ctx_heads = []
            for h in range(NHEAD):                   # static, NHEAD == 2
                qh = qkv[:, :, h * DH:(h + 1) * DH].astype(MM_DTYPE)
                kh = qkv[:, :, HID + h * DH: HID + (h + 1) * DH].astype(MM_DTYPE)
                vh = qkv[:, :, 2 * HID + h * DH: 2 * HID + (h + 1) * DH].astype(MM_DTYPE)
                # contraction over d (no explicit transpose of K)
                s = jnp.einsum('bqd,bkd->bqk', qh, kh,
                               preferred_element_type=jnp.float32) * scale
                s = s + add_mask                      # mask padded keys
                s = s - jnp.max(s, axis=-1, keepdims=True)
                p = jnp.exp(s)
                p = p * pl.reciprocal(jnp.sum(p, axis=-1, keepdims=True),
                                      approx=True)
                ctx_heads.append(
                    jnp.einsum('bqk,bkd->bqd', p.astype(MM_DTYPE), vh,
                               preferred_element_type=jnp.float32))
            ctx = jnp.concatenate(ctx_heads, axis=-1).reshape(TB * S, HID)

            attn = jnp.dot(ctx.astype(MM_DTYPE), wo_ref[l],
                           preferred_element_type=jnp.float32) + bo
            x = _layer_norm(x + attn, ln1g, ln1b)

            # ---- feed-forward ----------------------------------------------
            h1 = jnp.maximum(
                jnp.dot(x.astype(MM_DTYPE), w1_ref[l],
                        preferred_element_type=jnp.float32) + b1_ref[l], 0.0)
            h2 = jnp.dot(h1.astype(MM_DTYPE), w2_ref[l],
                         preferred_element_type=jnp.float32) + b2
            x = _layer_norm(x + h2, ln2g, ln2b)

        # token-0 hidden state of each batch element; classifier head runs in
        # the JAX wrapper (tiny 4-lane matmul would otherwise force a narrow
        # masked output store).
        out_ref[...] = x.reshape(TB, S, HID)[:, 0:1, :]

    return kernel


# ----------------------------------------------------------------------------
# Parameters / glue
# ----------------------------------------------------------------------------
def make_positional_encoding(max_len, d_model):
    position = jnp.arange(max_len, dtype=jnp.float32)[:, None]
    div_term = jnp.exp(jnp.arange(0, d_model, 2, dtype=jnp.float32)
                       * (-math.log(10000.0) / d_model))
    pe = jnp.zeros((max_len, d_model), jnp.float32)
    pe = pe.at[:, 0::2].set(jnp.sin(position * div_term))
    pe = pe.at[:, 1::2].set(jnp.cos(position * div_term))
    return pe


def init_params(key):
    ks = jax.random.split(key, 12)
    n = lambda k, shape, s=0.1: (s * jax.random.normal(k, shape)).astype(jnp.float32)
    bo = n(ks[5], (NLAYERS, 1, HID), 0.02)
    b2 = n(ks[6], (NLAYERS, 1, HID), 0.02)
    ones = jnp.ones((NLAYERS, 1, HID), jnp.float32)
    zeros = jnp.zeros((NLAYERS, 1, HID), jnp.float32)
    return {
        "emb":  n(ks[0], (VOCAB, EMB), 1.0),
        "pe":   make_positional_encoding(MAXLEN, EMB),
        # fused QKV projection (y = x @ Wqkv + bqkv, columns = [q | k | v])
        "wqkv": n(ks[1], (NLAYERS, HID, 3 * HID)),
        "bqkv": n(ks[2], (NLAYERS, 1, 3 * HID), 0.02),
        "wo":   n(ks[3], (NLAYERS, HID, HID)),
        "w1":   n(ks[4], (NLAYERS, HID, DFF)),
        "b1":   n(ks[7], (NLAYERS, 1, DFF), 0.02),
        "w2":   n(ks[8], (NLAYERS, DFF, HID)),
        # packed per-layer (1, HID) vectors: [bo, b2, ln1_g, ln1_b, ln2_g, ln2_b]
        "vecs": jnp.concatenate([bo, b2, ones, zeros, ones, zeros], axis=1),
        # classifier head (applied outside the kernel)
        "wout": n(ks[9], (HID, NCLASS)),
        "bout": n(ks[10], (1, NCLASS), 0.02),
    }


def _classifier_head(h0, params):
    logits = h0 @ params["wout"] + params["bout"]       # tiny (B,32)@(32,4), plain JAX
    return jax.nn.log_softmax(logits, axis=-1)


def _choose_tb(B, S):
    # Target ~512 folded rows per grid step (a few full MXU passes per layer
    # matmul) but keep >= 2 grid steps when B >= 2 so both v7x TensorCores
    # get work under dimension_semantics=("parallel",).
    tb = max(1, min(B, 512 // max(S, 1)))
    if B > 1:
        tb = min(tb, pl.cdiv(B, 2))
    return tb


def transformer_forward(tokens, lengths, params):
    """tokens: (B, S) int32 token ids; lengths: (B,) int32. Returns (B, C) log-probs."""
    B, S = tokens.shape

    # --- glue (plain JAX): embedding gather + positional encoding -----------
    emb = params["emb"][tokens]                          # (B, S, E)
    # TODO(synk): the reference PositionalEncoding does x.unsqueeze(1).repeat(1,1,64,1),
    # producing a 4-D tensor that nn.TransformerEncoder cannot consume; we apply the
    # standard "x + pe[:S]" broadcast (the intended behaviour) instead.
    x = (emb + params["pe"][:S][None, :, :]).astype(jnp.float32)

    # key-padding mask: 0 for valid keys, NEG_INF for padded keys
    pad = jnp.arange(S)[None, :] >= lengths[:, None]
    add_mask = jnp.where(pad, NEG_INF, 0.0).astype(jnp.float32).reshape(B, 1, S)

    # --- batch folding / padding ---------------------------------------------
    TB = _choose_tb(B, S)
    Bp = pl.cdiv(B, TB) * TB
    if Bp != B:
        x = jnp.pad(x, ((0, Bp - B), (0, 0), (0, 0)))
        add_mask = jnp.pad(add_mask, ((0, Bp - B), (0, 0), (0, 0)))

    # weights cast to bf16 once (halves weight DMA bytes; MXU accumulates f32)
    wqkv = params["wqkv"].astype(MM_DTYPE)
    wo = params["wo"].astype(MM_DTYPE)
    w1 = params["w1"].astype(MM_DTYPE)
    w2 = params["w2"].astype(MM_DTYPE)

    const3 = lambda a: pl.BlockSpec(a.shape, lambda i: (0, 0, 0))

    h0 = pl.pallas_call(
        _make_kernel(TB, S),
        out_shape=jax.ShapeDtypeStruct((Bp, 1, HID), jnp.float32),
        grid=(Bp // TB,),
        in_specs=[
            pl.BlockSpec((TB, S, HID), lambda i: (i, 0, 0)),   # activation tile
            pl.BlockSpec((TB, 1, S),   lambda i: (i, 0, 0)),   # additive key mask
            const3(wqkv), const3(params["bqkv"]), const3(wo),
            const3(w1), const3(params["b1"]), const3(w2),
            const3(params["vecs"]),
        ],
        out_specs=pl.BlockSpec((TB, 1, HID), lambda i: (i, 0, 0)),
        compiler_params=pltpu.CompilerParams(dimension_semantics=("parallel",)),
    )(x, add_mask, wqkv, params["bqkv"], wo, w1, params["b1"], w2, params["vecs"])

    h0 = h0[:B, 0, :]                                    # (B, HID) token-0 states
    return _classifier_head(h0, params)


# ----------------------------------------------------------------------------
# Pure-JAX reference with identical math/casting (numerical sanity check)
# ----------------------------------------------------------------------------
def reference_forward(tokens, lengths, params):
    B, S = tokens.shape
    x = (params["emb"][tokens] + params["pe"][:S][None, :, :]).astype(jnp.float32)
    pad = jnp.arange(S)[None, :] >= lengths[:, None]
    add_mask = jnp.where(pad, NEG_INF, 0.0).astype(jnp.float32)[:, None, :]
    scale = 1.0 / math.sqrt(DH)
    c = lambda a: a.astype(MM_DTYPE)
    for l in range(NLAYERS):
        vecs = params["vecs"][l]
        bo, b2 = vecs[0:1], vecs[1:2]
        ln1g, ln1b, ln2g, ln2b = vecs[2:3], vecs[3:4], vecs[4:5], vecs[5:6]
        qkv = jnp.einsum('bsh,hf->bsf', c(x), c(params["wqkv"][l]),
                         preferred_element_type=jnp.float32) + params["bqkv"][l]
        ctx = []
        for h in range(NHEAD):
            qh = c(qkv[..., h * DH:(h + 1) * DH])
            kh = c(qkv[..., HID + h * DH: HID + (h + 1) * DH])
            vh = c(qkv[..., 2 * HID + h * DH: 2 * HID + (h + 1) * DH])
            s = jnp.einsum('bqd,bkd->bqk', qh, kh,
                           preferred_element_type=jnp.float32) * scale + add_mask
            p = jax.nn.softmax(s, axis=-1)
            ctx.append(jnp.einsum('bqk,bkd->bqd', c(p), vh,
                                  preferred_element_type=jnp.float32))
        attn = jnp.einsum('bsh,ho->bso', c(jnp.concatenate(ctx, -1)),
                          c(params["wo"][l]),
                          preferred_element_type=jnp.float32) + bo
        x = _layer_norm(x + attn, ln1g, ln1b)
        h1 = jnp.maximum(jnp.einsum('bsh,hf->bsf', c(x), c(params["w1"][l]),
                                    preferred_element_type=jnp.float32)
                         + params["b1"][l], 0.0)
        h2 = jnp.einsum('bsf,fh->bsh', c(h1), c(params["w2"][l]),
                        preferred_element_type=jnp.float32) + b2
        x = _layer_norm(x + h2, ln2g, ln2b)
    return _classifier_head(x[:, 0, :], params)


if __name__ == "__main__":
    key = jax.random.PRNGKey(0)
    k_tok, k_par = jax.random.split(key)

    B, S = 2, 8
    tokens = jax.random.randint(k_tok, (B, S), 0, VOCAB, dtype=jnp.int32)
    lengths = jnp.array([8, 5], dtype=jnp.int32)
    params = init_params(k_par)

    log_probs = jax.block_until_ready(transformer_forward(tokens, lengths, params))
    ref = jax.block_until_ready(reference_forward(tokens, lengths, params))

    assert log_probs.shape == (B, NCLASS)
    assert bool(jnp.all(jnp.isfinite(log_probs)))
    # log_probs of each row should sum to ~1 in prob space
    assert bool(jnp.all(jnp.abs(jnp.sum(jnp.exp(log_probs), axis=1) - 1.0) < 1e-3))
    assert float(jnp.max(jnp.abs(log_probs - ref))) < 2e-2

    print("KERNEL_OK")
</pallas_src>

<mosaic_0001>
module attributes {stable_mosaic.version = 11 : i64} {
  func.func @kernel(%arg0: i32, %arg1: memref<1x8x32xf32, #tpu.memory_space<vmem>>, %arg2: memref<1x1x8xf32, #tpu.memory_space<vmem>>, %arg3: memref<2x32x96xbf16, #tpu.memory_space<vmem>>, %arg4: memref<2x1x96xf32, #tpu.memory_space<vmem>>, %arg5: memref<2x32x32xbf16, #tpu.memory_space<vmem>>, %arg6: memref<2x32x64xbf16, #tpu.memory_space<vmem>>, %arg7: memref<2x1x64xf32, #tpu.memory_space<vmem>>, %arg8: memref<2x64x32xbf16, #tpu.memory_space<vmem>>, %arg9: memref<2x6x32xf32, #tpu.memory_space<vmem>>, %arg10: memref<1x1x32xf32, #tpu.memory_space<vmem>>) attributes {dimension_semantics = [#tpu.dimension_semantics<parallel>], iteration_bounds = array<i64: 2>, scalar_prefetch = 0 : i64, scratch_operands = 0 : i64, tpu.core_type = #tpu.core_type<tc>, window_params = [{transform_indices = @transform_0, window_bounds = array<i64: 1, 8, 32>}, {transform_indices = @transform_1, window_bounds = array<i64: 1, 1, 8>}, {pipeline_mode = #tpu.pipeline_mode<synchronous>, transform_indices = @transform_2, window_bounds = array<i64: 2, 32, 96>}, {pipeline_mode = #tpu.pipeline_mode<synchronous>, transform_indices = @transform_3, window_bounds = array<i64: 2, 1, 96>}, {pipeline_mode = #tpu.pipeline_mode<synchronous>, transform_indices = @transform_4, window_bounds = array<i64: 2, 32, 32>}, {pipeline_mode = #tpu.pipeline_mode<synchronous>, transform_indices = @transform_5, window_bounds = array<i64: 2, 32, 64>}, {pipeline_mode = #tpu.pipeline_mode<synchronous>, transform_indices = @transform_6, window_bounds = array<i64: 2, 1, 64>}, {pipeline_mode = #tpu.pipeline_mode<synchronous>, transform_indices = @transform_7, window_bounds = array<i64: 2, 64, 32>}, {pipeline_mode = #tpu.pipeline_mode<synchronous>, transform_indices = @transform_8, window_bounds = array<i64: 2, 6, 32>}, {transform_indices = @transform_9, window_bounds = array<i64: 1, 1, 32>}]} {
    %c0 = arith.constant 0 : index
    %c0_0 = arith.constant 0 : index
    %c0_1 = arith.constant 0 : index
    %0 = vector.load %arg1[%c0, %c0_0, %c0_1] : memref<1x8x32xf32, #tpu.memory_space<vmem>>, vector<1x8x32xf32>
    %1 = vector.shape_cast %0 : vector<1x8x32xf32> to vector<8x32xf32>
    %c0_2 = arith.constant 0 : index
    %c0_3 = arith.constant 0 : index
    %c0_4 = arith.constant 0 : index
    %2 = vector.load %arg2[%c0_2, %c0_3, %c0_4] : memref<1x1x8xf32, #tpu.memory_space<vmem>>, vector<1x1x8xf32>
    %c0_5 = arith.constant 0 : index
    %c0_6 = arith.constant 0 : index
    %c0_7 = arith.constant 0 : index
    %3 = vector.load %arg9[%c0_5, %c0_6, %c0_7] : memref<2x6x32xf32, #tpu.memory_space<vmem>>, vector<1x6x32xf32>
    %4 = vector.shape_cast %3 : vector<1x6x32xf32> to vector<6x32xf32>
    %5 = vector.extract_strided_slice %4 {offsets = [0, 0], sizes = [1, 32], strides = [1, 1]} : vector<6x32xf32> to vector<1x32xf32>
    %6 = vector.extract_strided_slice %4 {offsets = [1, 0], sizes = [1, 32], strides = [1, 1]} : vector<6x32xf32> to vector<1x32xf32>
    %7 = vector.extract_strided_slice %4 {offsets = [2, 0], sizes = [1, 32], strides = [1, 1]} : vector<6x32xf32> to vector<1x32xf32>
    %8 = vector.extract_strided_slice %4 {offsets = [3, 0], sizes = [1, 32], strides = [1, 1]} : vector<6x32xf32> to vector<1x32xf32>
    %9 = vector.extract_strided_slice %4 {offsets = [4, 0], sizes = [1, 32], strides = [1, 1]} : vector<6x32xf32> to vector<1x32xf32>
    %10 = vector.extract_strided_slice %4 {offsets = [5, 0], sizes = [1, 32], strides = [1, 1]} : vector<6x32xf32> to vector<1x32xf32>
    %11 = arith.truncf %1 : vector<8x32xf32> to vector<8x32xbf16>
    %c0_8 = arith.constant 0 : index
    %c0_9 = arith.constant 0 : index
    %c0_10 = arith.constant 0 : index
    %12 = vector.load %arg3[%c0_8, %c0_9, %c0_10] : memref<2x32x96xbf16, #tpu.memory_space<vmem>>, vector<1x32x96xbf16>
    %13 = vector.shape_cast %12 : vector<1x32x96xbf16> to vector<32x96xbf16>
    %cst = arith.constant dense<0.000000e+00> : vector<8x96xf32>
    %14 = tpu.matmul %11, %13, %cst {dimension_numbers = #tpu.dot_dimension_numbers<[1], [0], [0], [1], [0, 0, 1, 1], [], []>} : vector<8x32xbf16>, vector<32x96xbf16>, vector<8x96xf32> -> vector<8x96xf32>
    %c0_11 = arith.constant 0 : index
    %c0_12 = arith.constant 0 : index
    %c0_13 = arith.constant 0 : index
    %15 = vector.load %arg4[%c0_11, %c0_12, %c0_13] : memref<2x1x96xf32, #tpu.memory_space<vmem>>, vector<1x1x96xf32>
    %16 = vector.shape_cast %15 : vector<1x1x96xf32> to vector<1x96xf32>
    %17 = vector.broadcast %16 : vector<1x96xf32> to vector<8x96xf32>
    %18 = arith.addf %14, %17 : vector<8x96xf32>
    %19 = vector.shape_cast %18 : vector<8x96xf32> to vector<1x8x96xf32>
    %20 = vector.extract_strided_slice %19 {offsets = [0, 0, 0], sizes = [1, 8, 16], strides = [1, 1, 1]} : vector<1x8x96xf32> to vector<1x8x16xf32>
    %21 = arith.truncf %20 : vector<1x8x16xf32> to vector<1x8x16xbf16>
    %22 = vector.extract_strided_slice %19 {offsets = [0, 0, 32], sizes = [1, 8, 16], strides = [1, 1, 1]} : vector<1x8x96xf32> to vector<1x8x16xf32>
    %23 = arith.truncf %22 : vector<1x8x16xf32> to vector<1x8x16xbf16>
    %24 = vector.extract_strided_slice %19 {offsets = [0, 0, 64], sizes = [1, 8, 16], strides = [1, 1, 1]} : vector<1x8x96xf32> to vector<1x8x16xf32>
    %25 = arith.truncf %24 : vector<1x8x16xf32> to vector<1x8x16xbf16>
    "tpu.trace_start"() <{level = 10 : i32, message = "bqd,bkd->bqk"}> : () -> ()
    %cst_14 = arith.constant dense<0.000000e+00> : vector<1x8x8xf32>
    %26 = tpu.matmul %21, %23, %cst_14 {dimension_numbers = #tpu.dot_dimension_numbers<[2], [2], [1], [1], [0, 0, 0, 1, 1, 1], [0], [0]>} : vector<1x8x16xbf16>, vector<1x8x16xbf16>, vector<1x8x8xf32> -> vector<1x8x8xf32>
    "tpu.trace_stop"() : () -> ()
    %cst_15 = arith.constant 2.500000e-01 : f32
    %27 = vector.broadcast %cst_15 : f32 to vector<1x8x8xf32>
    %28 = arith.mulf %26, %27 : vector<1x8x8xf32>
    %29 = vector.broadcast %2 : vector<1x1x8xf32> to vector<1x8x8xf32>
    %30 = arith.addf %28, %29 : vector<1x8x8xf32>
    %cst_16 = arith.constant dense<0xFF800000> : vector<1x8xf32>
    %31 = vector.multi_reduction <maximumf>, %30, %cst_16 [2] : vector<1x8x8xf32> to vector<1x8xf32>
    %32 = vector.shape_cast %31 : vector<1x8xf32> to vector<1x8x1xf32>
    %33 = vector.broadcast %32 : vector<1x8x1xf32> to vector<1x8x8xf32>
    %34 = arith.subf %30, %33 : vector<1x8x8xf32>
    %35 = math.exp %34 : vector<1x8x8xf32>
    %cst_17 = arith.constant dense<0.000000e+00> : vector<1x8xf32>
    %36 = vector.multi_reduction <add>, %35, %cst_17 [2] : vector<1x8x8xf32> to vector<1x8xf32>
    %37 = vector.shape_cast %36 : vector<1x8xf32> to vector<1x8x1xf32>
    %38 = tpu.reciprocal %37 {approx = true} : vector<1x8x1xf32> -> vector<1x8x1xf32>
    %39 = vector.broadcast %38 : vector<1x8x1xf32> to vector<1x8x8xf32>
    %40 = arith.mulf %35, %39 : vector<1x8x8xf32>
    %41 = arith.truncf %40 : vector<1x8x8xf32> to vector<1x8x8xbf16>
    "tpu.trace_start"() <{level = 10 : i32, message = "bqk,bkd->bqd"}> : () -> ()
    %cst_18 = arith.constant dense<0.000000e+00> : vector<1x8x16xf32>
    %42 = tpu.matmul %41, %25, %cst_18 {dimension_numbers = #tpu.dot_dimension_numbers<[2], [1], [1], [2], [0, 0, 0, 1, 1, 2], [0], [0]>} : vector<1x8x8xbf16>, vector<1x8x16xbf16>, vector<1x8x16xf32> -> vector<1x8x16xf32>
    "tpu.trace_stop"() : () -> ()
    %43 = vector.extract_strided_slice %19 {offsets = [0, 0, 16], sizes = [1, 8, 16], strides = [1, 1, 1]} : vector<1x8x96xf32> to vector<1x8x16xf32>
    %44 = arith.truncf %43 : vector<1x8x16xf32> to vector<1x8x16xbf16>
    %45 = vector.extract_strided_slice %19 {offsets = [0, 0, 48], sizes = [1, 8, 16], strides = [1, 1, 1]} : vector<1x8x96xf32> to vector<1x8x16xf32>
    %46 = arith.truncf %45 : vector<1x8x16xf32> to vector<1x8x16xbf16>
    %47 = vector.extract_strided_slice %19 {offsets = [0, 0, 80], sizes = [1, 8, 16], strides = [1, 1, 1]} : vector<1x8x96xf32> to vector<1x8x16xf32>
    %48 = arith.truncf %47 : vector<1x8x16xf32> to vector<1x8x16xbf16>
    "tpu.trace_start"() <{level = 10 : i32, message = "bqd,bkd->bqk"}> : () -> ()
    %cst_19 = arith.constant dense<0.000000e+00> : vector<1x8x8xf32>
    %49 = tpu.matmul %44, %46, %cst_19 {dimension_numbers = #tpu.dot_dimension_numbers<[2], [2], [1], [1], [0, 0, 0, 1, 1, 1], [0], [0]>} : vector<1x8x16xbf16>, vector<1x8x16xbf16>, vector<1x8x8xf32> -> vector<1x8x8xf32>
    "tpu.trace_stop"() : () -> ()
    %cst_20 = arith.constant 2.500000e-01 : f32
    %50 = vector.broadcast %cst_20 : f32 to vector<1x8x8xf32>
    %51 = arith.mulf %49, %50 : vector<1x8x8xf32>
    %52 = vector.broadcast %2 : vector<1x1x8xf32> to vector<1x8x8xf32>
    %53 = arith.addf %51, %52 : vector<1x8x8xf32>
    %cst_21 = arith.constant dense<0xFF800000> : vector<1x8xf32>
    %54 = vector.multi_reduction <maximumf>, %53, %cst_21 [2] : vector<1x8x8xf32> to vector<1x8xf32>
    %55 = vector.shape_cast %54 : vector<1x8xf32> to vector<1x8x1xf32>
    %56 = vector.broadcast %55 : vector<1x8x1xf32> to vector<1x8x8xf32>
    %57 = arith.subf %53, %56 : vector<1x8x8xf32>
    %58 = math.exp %57 : vector<1x8x8xf32>
    %cst_22 = arith.constant dense<0.000000e+00> : vector<1x8xf32>
    %59 = vector.multi_reduction <add>, %58, %cst_22 [2] : vector<1x8x8xf32> to vector<1x8xf32>
    %60 = vector.shape_cast %59 : vector<1x8xf32> to vector<1x8x1xf32>
    %61 = tpu.reciprocal %60 {approx = true} : vector<1x8x1xf32> -> vector<1x8x1xf32>
    %62 = vector.broadcast %61 : vector<1x8x1xf32> to vector<1x8x8xf32>
    %63 = arith.mulf %58, %62 : vector<1x8x8xf32>
    %64 = arith.truncf %63 : vector<1x8x8xf32> to vector<1x8x8xbf16>
    "tpu.trace_start"() <{level = 10 : i32, message = "bqk,bkd->bqd"}> : () -> ()
    %cst_23 = arith.constant dense<0.000000e+00> : vector<1x8x16xf32>
    %65 = tpu.matmul %64, %48, %cst_23 {dimension_numbers = #tpu.dot_dimension_numbers<[2], [1], [1], [2], [0, 0, 0, 1, 1, 2], [0], [0]>} : vector<1x8x8xbf16>, vector<1x8x16xbf16>, vector<1x8x16xf32> -> vector<1x8x16xf32>
    "tpu.trace_stop"() : () -> ()
    %66 = tpu.concatenate %42, %65 in 2 : vector<1x8x16xf32>, vector<1x8x16xf32> -> vector<1x8x32xf32>
    %67 = vector.shape_cast %66 : vector<1x8x32xf32> to vector<8x32xf32>
    %68 = arith.truncf %67 : vector<8x32xf32> to vector<8x32xbf16>
    %c0_24 = arith.constant 0 : index
    %c0_25 = arith.constant 0 : index
    %c0_26 = arith.constant 0 : index
    %69 = vector.load %arg5[%c0_24, %c0_25, %c0_26] : memref<2x32x32xbf16, #tpu.memory_space<vmem>>, vector<1x32x32xbf16>
    %70 = vector.shape_cast %69 : vector<1x32x32xbf16> to vector<32x32xbf16>
    %cst_27 = arith.constant dense<0.000000e+00> : vector<8x32xf32>
    %71 = tpu.matmul %68, %70, %cst_27 {dimension_numbers = #tpu.dot_dimension_numbers<[1], [0], [0], [1], [0, 0, 1, 1], [], []>} : vector<8x32xbf16>, vector<32x32xbf16>, vector<8x32xf32> -> vector<8x32xf32>
    %72 = vector.broadcast %5 : vector<1x32xf32> to vector<8x32xf32>
    %73 = arith.addf %71, %72 : vector<8x32xf32>
    %74 = arith.addf %1, %73 : vector<8x32xf32>
    %cst_28 = arith.constant dense<0.000000e+00> : vector<8xf32>
    %75 = vector.multi_reduction <add>, %74, %cst_28 [1] : vector<8x32xf32> to vector<8xf32>
    %76 = vector.shape_cast %75 : vector<8xf32> to vector<8x1xf32>
    %cst_29 = arith.constant 3.200000e+01 : f32
    %77 = vector.broadcast %cst_29 : f32 to vector<8x1xf32>
    %78 = arith.divf %76, %77 : vector<8x1xf32>
    %79 = vector.broadcast %78 : vector<8x1xf32> to vector<8x32xf32>
    %80 = arith.subf %74, %79 : vector<8x32xf32>
    %81 = vector.broadcast %78 : vector<8x1xf32> to vector<8x32xf32>
    %82 = arith.subf %74, %81 : vector<8x32xf32>
    %83 = arith.mulf %80, %82 : vector<8x32xf32>
    %cst_30 = arith.constant dense<0.000000e+00> : vector<8xf32>
    %84 = vector.multi_reduction <add>, %83, %cst_30 [1] : vector<8x32xf32> to vector<8xf32>
    %85 = vector.shape_cast %84 : vector<8xf32> to vector<8x1xf32>
    %cst_31 = arith.constant 3.200000e+01 : f32
    %86 = vector.broadcast %cst_31 : f32 to vector<8x1xf32>
    %87 = arith.divf %85, %86 : vector<8x1xf32>
    %88 = vector.broadcast %78 : vector<8x1xf32> to vector<8x32xf32>
    %89 = arith.subf %74, %88 : vector<8x32xf32>
    %cst_32 = arith.constant 9.99999974E-6 : f32
    %90 = vector.broadcast %cst_32 : f32 to vector<8x1xf32>
    %91 = arith.addf %87, %90 : vector<8x1xf32>
    %92 = math.rsqrt %91 : vector<8x1xf32>
    %93 = vector.broadcast %92 : vector<8x1xf32> to vector<8x32xf32>
    %94 = arith.mulf %89, %93 : vector<8x32xf32>
    %95 = vector.broadcast %7 : vector<1x32xf32> to vector<8x32xf32>
    %96 = arith.mulf %94, %95 : vector<8x32xf32>
    %97 = vector.broadcast %8 : vector<1x32xf32> to vector<8x32xf32>
    %98 = arith.addf %96, %97 : vector<8x32xf32>
    %99 = arith.truncf %98 : vector<8x32xf32> to vector<8x32xbf16>
    %c0_33 = arith.constant 0 : index
    %c0_34 = arith.constant 0 : index
    %c0_35 = arith.constant 0 : index
    %100 = vector.load %arg6[%c0_33, %c0_34, %c0_35] : memref<2x32x64xbf16, #tpu.memory_space<vmem>>, vector<1x32x64xbf16>
    %101 = vector.shape_cast %100 : vector<1x32x64xbf16> to vector<32x64xbf16>
    %cst_36 = arith.constant dense<0.000000e+00> : vector<8x64xf32>
    %102 = tpu.matmul %99, %101, %cst_36 {dimension_numbers = #tpu.dot_dimension_numbers<[1], [0], [0], [1], [0, 0, 1, 1], [], []>} : vector<8x32xbf16>, vector<32x64xbf16>, vector<8x64xf32> -> vector<8x64xf32>
    %c0_37 = arith.constant 0 : index
    %c0_38 = arith.constant 0 : index
    %c0_39 = arith.constant 0 : index
    %103 = vector.load %arg7[%c0_37, %c0_38, %c0_39] : memref<2x1x64xf32, #tpu.memory_space<vmem>>, vector<1x1x64xf32>
    %104 = vector.shape_cast %103 : vector<1x1x64xf32> to vector<1x64xf32>
    %105 = vector.broadcast %104 : vector<1x64xf32> to vector<8x64xf32>
    %106 = arith.addf %102, %105 : vector<8x64xf32>
    %cst_40 = arith.constant 0.000000e+00 : f32
    %107 = vector.broadcast %cst_40 : f32 to vector<8x64xf32>
    %108 = arith.maximumf %106, %107 : vector<8x64xf32>
    %109 = arith.truncf %108 : vector<8x64xf32> to vector<8x64xbf16>
    %c0_41 = arith.constant 0 : index
    %c0_42 = arith.constant 0 : index
    %c0_43 = arith.constant 0 : index
    %110 = vector.load %arg8[%c0_41, %c0_42, %c0_43] : memref<2x64x32xbf16, #tpu.memory_space<vmem>>, vector<1x64x32xbf16>
    %111 = vector.shape_cast %110 : vector<1x64x32xbf16> to vector<64x32xbf16>
    %cst_44 = arith.constant dense<0.000000e+00> : vector<8x32xf32>
    %112 = tpu.matmul %109, %111, %cst_44 {dimension_numbers = #tpu.dot_dimension_numbers<[1], [0], [0], [1], [0, 0, 1, 1], [], []>} : vector<8x64xbf16>, vector<64x32xbf16>, vector<8x32xf32> -> vector<8x32xf32>
    %113 = vector.broadcast %6 : vector<1x32xf32> to vector<8x32xf32>
    %114 = arith.addf %112, %113 : vector<8x32xf32>
    %115 = arith.addf %98, %114 : vector<8x32xf32>
    %cst_45 = arith.constant dense<0.000000e+00> : vector<8xf32>
    %116 = vector.multi_reduction <add>, %115, %cst_45 [1] : vector<8x32xf32> to vector<8xf32>
    %117 = vector.shape_cast %116 : vector<8xf32> to vector<8x1xf32>
    %cst_46 = arith.constant 3.200000e+01 : f32
    %118 = vector.broadcast %cst_46 : f32 to vector<8x1xf32>
    %119 = arith.divf %117, %118 : vector<8x1xf32>
    %120 = vector.broadcast %119 : vector<8x1xf32> to vector<8x32xf32>
    %121 = arith.subf %115, %120 : vector<8x32xf32>
    %122 = vector.broadcast %119 : vector<8x1xf32> to vector<8x32xf32>
    %123 = arith.subf %115, %122 : vector<8x32xf32>
    %124 = arith.mulf %121, %123 : vector<8x32xf32>
    %cst_47 = arith.constant dense<0.000000e+00> : vector<8xf32>
    %125 = vector.multi_reduction <add>, %124, %cst_47 [1] : vector<8x32xf32> to vector<8xf32>
    %126 = vector.shape_cast %125 : vector<8xf32> to vector<8x1xf32>
    %cst_48 = arith.constant 3.200000e+01 : f32
    %127 = vector.broadcast %cst_48 : f32 to vector<8x1xf32>
    %128 = arith.divf %126, %127 : vector<8x1xf32>
    %129 = vector.broadcast %119 : vector<8x1xf32> to vector<8x32xf32>
    %130 = arith.subf %115, %129 : vector<8x32xf32>
    %cst_49 = arith.constant 9.99999974E-6 : f32
    %131 = vector.broadcast %cst_49 : f32 to vector<8x1xf32>
    %132 = arith.addf %128, %131 : vector<8x1xf32>
    %133 = math.rsqrt %132 : vector<8x1xf32>
    %134 = vector.broadcast %133 : vector<8x1xf32> to vector<8x32xf32>
    %135 = arith.mulf %130, %134 : vector<8x32xf32>
    %136 = vector.broadcast %9 : vector<1x32xf32> to vector<8x32xf32>
    %137 = arith.mulf %135, %136 : vector<8x32xf32>
    %138 = vector.broadcast %10 : vector<1x32xf32> to vector<8x32xf32>
    %139 = arith.addf %137, %138 : vector<8x32xf32>
    %c1 = arith.constant 1 : index
    %c0_50 = arith.constant 0 : index
    %c0_51 = arith.constant 0 : index
    %140 = vector.load %arg9[%c1, %c0_50, %c0_51] : memref<2x6x32xf32, #tpu.memory_space<vmem>>, vector<1x6x32xf32>
    %141 = vector.shape_cast %140 : vector<1x6x32xf32> to vector<6x32xf32>
    %142 = vector.extract_strided_slice %141 {offsets = [0, 0], sizes = [1, 32], strides = [1, 1]} : vector<6x32xf32> to vector<1x32xf32>
    %143 = vector.extract_strided_slice %141 {offsets = [1, 0], sizes = [1, 32], strides = [1, 1]} : vector<6x32xf32> to vector<1x32xf32>
    %144 = vector.extract_strided_slice %141 {offsets = [2, 0], sizes = [1, 32], strides = [1, 1]} : vector<6x32xf32> to vector<1x32xf32>
    %145 = vector.extract_strided_slice %141 {offsets = [3, 0], sizes = [1, 32], strides = [1, 1]} : vector<6x32xf32> to vector<1x32xf32>
    %146 = vector.extract_strided_slice %141 {offsets = [4, 0], sizes = [1, 32], strides = [1, 1]} : vector<6x32xf32> to vector<1x32xf32>
    %147 = vector.extract_strided_slice %141 {offsets = [5, 0], sizes = [1, 32], strides = [1, 1]} : vector<6x32xf32> to vector<1x32xf32>
    %148 = arith.truncf %139 : vector<8x32xf32> to vector<8x32xbf16>
    %c1_52 = arith.constant 1 : index
    %c0_53 = arith.constant 0 : index
    %c0_54 = arith.constant 0 : index
    %149 = vector.load %arg3[%c1_52, %c0_53, %c0_54] : memref<2x32x96xbf16, #tpu.memory_space<vmem>>, vector<1x32x96xbf16>
    %150 = vector.shape_cast %149 : vector<1x32x96xbf16> to vector<32x96xbf16>
    %cst_55 = arith.constant dense<0.000000e+00> : vector<8x96xf32>
    %151 = tpu.matmul %148, %150, %cst_55 {dimension_numbers = #tpu.dot_dimension_numbers<[1], [0], [0], [1], [0, 0, 1, 1], [], []>} : vector<8x32xbf16>, vector<32x96xbf16>, vector<8x96xf32> -> vector<8x96xf32>
    %c1_56 = arith.constant 1 : index
    %c0_57 = arith.constant 0 : index
    %c0_58 = arith.constant 0 : index
    %152 = vector.load %arg4[%c1_56, %c0_57, %c0_58] : memref<2x1x96xf32, #tpu.memory_space<vmem>>, vector<1x1x96xf32>
    %153 = vector.shape_cast %152 : vector<1x1x96xf32> to vector<1x96xf32>
    %154 = vector.broadcast %153 : vector<1x96xf32> to vector<8x96xf32>
    %155 = arith.addf %151, %154 : vector<8x96xf32>
    %156 = vector.shape_cast %155 : vector<8x96xf32> to vector<1x8x96xf32>
    %157 = vector.extract_strided_slice %156 {offsets = [0, 0, 0], sizes = [1, 8, 16], strides = [1, 1, 1]} : vector<1x8x96xf32> to vector<1x8x16xf32>
    %158 = arith.truncf %157 : vector<1x8x16xf32> to vector<1x8x16xbf16>
    %159 = vector.extract_strided_slice %156 {offsets = [0, 0, 32], sizes = [1, 8, 16], strides = [1, 1, 1]} : vector<1x8x96xf32> to vector<1x8x16xf32>
    %160 = arith.truncf %159 : vector<1x8x16xf32> to vector<1x8x16xbf16>
    %161 = vector.extract_strided_slice %156 {offsets = [0, 0, 64], sizes = [1, 8, 16], strides = [1, 1, 1]} : vector<1x8x96xf32> to vector<1x8x16xf32>
    %162 = arith.truncf %161 : vector<1x8x16xf32> to vector<1x8x16xbf16>
    "tpu.trace_start"() <{level = 10 : i32, message = "bqd,bkd->bqk"}> : () -> ()
    %cst_59 = arith.constant dense<0.000000e+00> : vector<1x8x8xf32>
    %163 = tpu.matmul %158, %160, %cst_59 {dimension_numbers = #tpu.dot_dimension_numbers<[2], [2], [1], [1], [0, 0, 0, 1, 1, 1], [0], [0]>} : vector<1x8x16xbf16>, vector<1x8x16xbf16>, vector<1x8x8xf32> -> vector<1x8x8xf32>
    "tpu.trace_stop"() : () -> ()
    %cst_60 = arith.constant 2.500000e-01 : f32
    %164 = vector.broadcast %cst_60 : f32 to vector<1x8x8xf32>
    %165 = arith.mulf %163, %164 : vector<1x8x8xf32>
    %166 = vector.broadcast %2 : vector<1x1x8xf32> to vector<1x8x8xf32>
    %167 = arith.addf %165, %166 : vector<1x8x8xf32>
    %cst_61 = arith.constant dense<0xFF800000> : vector<1x8xf32>
    %168 = vector.multi_reduction <maximumf>, %167, %cst_61 [2] : vector<1x8x8xf32> to vector<1x8xf32>
    %169 = vector.shape_cast %168 : vector<1x8xf32> to vector<1x8x1xf32>
    %170 = vector.broadcast %169 : vector<1x8x1xf32> to vector<1x8x8xf32>
    %171 = arith.subf %167, %170 : vector<1x8x8xf32>
    %172 = math.exp %171 : vector<1x8x8xf32>
    %cst_62 = arith.constant dense<0.000000e+00> : vector<1x8xf32>
    %173 = vector.multi_reduction <add>, %172, %cst_62 [2] : vector<1x8x8xf32> to vector<1x8xf32>
    %174 = vector.shape_cast %173 : vector<1x8xf32> to vector<1x8x1xf32>
    %175 = tpu.reciprocal %174 {approx = true} : vector<1x8x1xf32> -> vector<1x8x1xf32>
    %176 = vector.broadcast %175 : vector<1x8x1xf32> to vector<1x8x8xf32>
    %177 = arith.mulf %172, %176 : vector<1x8x8xf32>
    %178 = arith.truncf %177 : vector<1x8x8xf32> to vector<1x8x8xbf16>
    "tpu.trace_start"() <{level = 10 : i32, message = "bqk,bkd->bqd"}> : () -> ()
    %cst_63 = arith.constant dense<0.000000e+00> : vector<1x8x16xf32>
    %179 = tpu.matmul %178, %162, %cst_63 {dimension_numbers = #tpu.dot_dimension_numbers<[2], [1], [1], [2], [0, 0, 0, 1, 1, 2], [0], [0]>} : vector<1x8x8xbf16>, vector<1x8x16xbf16>, vector<1x8x16xf32> -> vector<1x8x16xf32>
    "tpu.trace_stop"() : () -> ()
    %180 = vector.extract_strided_slice %156 {offsets = [0, 0, 16], sizes = [1, 8, 16], strides = [1, 1, 1]} : vector<1x8x96xf32> to vector<1x8x16xf32>
    %181 = arith.truncf %180 : vector<1x8x16xf32> to vector<1x8x16xbf16>
    %182 = vector.extract_strided_slice %156 {offsets = [0, 0, 48], sizes = [1, 8, 16], strides = [1, 1, 1]} : vector<1x8x96xf32> to vector<1x8x16xf32>
    %183 = arith.truncf %182 : vector<1x8x16xf32> to vector<1x8x16xbf16>
    %184 = vector.extract_strided_slice %156 {offsets = [0, 0, 80], sizes = [1, 8, 16], strides = [1, 1, 1]} : vector<1x8x96xf32> to vector<1x8x16xf32>
    %185 = arith.truncf %184 : vector<1x8x16xf32> to vector<1x8x16xbf16>
    "tpu.trace_start"() <{level = 10 : i32, message = "bqd,bkd->bqk"}> : () -> ()
    %cst_64 = arith.constant dense<0.000000e+00> : vector<1x8x8xf32>
    %186 = tpu.matmul %181, %183, %cst_64 {dimension_numbers = #tpu.dot_dimension_numbers<[2], [2], [1], [1], [0, 0, 0, 1, 1, 1], [0], [0]>} : vector<1x8x16xbf16>, vector<1x8x16xbf16>, vector<1x8x8xf32> -> vector<1x8x8xf32>
    "tpu.trace_stop"() : () -> ()
    %cst_65 = arith.constant 2.500000e-01 : f32
    %187 = vector.broadcast %cst_65 : f32 to vector<1x8x8xf32>
    %188 = arith.mulf %186, %187 : vector<1x8x8xf32>
    %189 = vector.broadcast %2 : vector<1x1x8xf32> to vector<1x8x8xf32>
    %190 = arith.addf %188, %189 : vector<1x8x8xf32>
    %cst_66 = arith.constant dense<0xFF800000> : vector<1x8xf32>
    %191 = vector.multi_reduction <maximumf>, %190, %cst_66 [2] : vector<1x8x8xf32> to vector<1x8xf32>
    %192 = vector.shape_cast %191 : vector<1x8xf32> to vector<1x8x1xf32>
    %193 = vector.broadcast %192 : vector<1x8x1xf32> to vector<1x8x8xf32>
    %194 = arith.subf %190, %193 : vector<1x8x8xf32>
    %195 = math.exp %194 : vector<1x8x8xf32>
    %cst_67 = arith.constant dense<0.000000e+00> : vector<1x8xf32>
    %196 = vector.multi_reduction <add>, %195, %cst_67 [2] : vector<1x8x8xf32> to vector<1x8xf32>
    %197 = vector.shape_cast %196 : vector<1x8xf32> to vector<1x8x1xf32>
    %198 = tpu.reciprocal %197 {approx = true} : vector<1x8x1xf32> -> vector<1x8x1xf32>
    %199 = vector.broadcast %198 : vector<1x8x1xf32> to vector<1x8x8xf32>
    %200 = arith.mulf %195, %199 : vector<1x8x8xf32>
    %201 = arith.truncf %200 : vector<1x8x8xf32> to vector<1x8x8xbf16>
    "tpu.trace_start"() <{level = 10 : i32, message = "bqk,bkd->bqd"}> : () -> ()
    %cst_68 = arith.constant dense<0.000000e+00> : vector<1x8x16xf32>
    %202 = tpu.matmul %201, %185, %cst_68 {dimension_numbers = #tpu.dot_dimension_numbers<[2], [1], [1], [2], [0, 0, 0, 1, 1, 2], [0], [0]>} : vector<1x8x8xbf16>, vector<1x8x16xbf16>, vector<1x8x16xf32> -> vector<1x8x16xf32>
    "tpu.trace_stop"() : () -> ()
    %203 = tpu.concatenate %179, %202 in 2 : vector<1x8x16xf32>, vector<1x8x16xf32> -> vector<1x8x32xf32>
    %204 = vector.shape_cast %203 : vector<1x8x32xf32> to vector<8x32xf32>
    %205 = arith.truncf %204 : vector<8x32xf32> to vector<8x32xbf16>
    %c1_69 = arith.constant 1 : index
    %c0_70 = arith.constant 0 : index
    %c0_71 = arith.constant 0 : index
    %206 = vector.load %arg5[%c1_69, %c0_70, %c0_71] : memref<2x32x32xbf16, #tpu.memory_space<vmem>>, vector<1x32x32xbf16>
    %207 = vector.shape_cast %206 : vector<1x32x32xbf16> to vector<32x32xbf16>
    %cst_72 = arith.constant dense<0.000000e+00> : vector<8x32xf32>
    %208 = tpu.matmul %205, %207, %cst_72 {dimension_numbers = #tpu.dot_dimension_numbers<[1], [0], [0], [1], [0, 0, 1, 1], [], []>} : vector<8x32xbf16>, vector<32x32xbf16>, vector<8x32xf32> -> vector<8x32xf32>
    %209 = vector.broadcast %142 : vector<1x32xf32> to vector<8x32xf32>
    %210 = arith.addf %208, %209 : vector<8x32xf32>
    %211 = arith.addf %139, %210 : vector<8x32xf32>
    %cst_73 = arith.constant dense<0.000000e+00> : vector<8xf32>
    %212 = vector.multi_reduction <add>, %211, %cst_73 [1] : vector<8x32xf32> to vector<8xf32>
    %213 = vector.shape_cast %212 : vector<8xf32> to vector<8x1xf32>
    %cst_74 = arith.constant 3.200000e+01 : f32
    %214 = vector.broadcast %cst_74 : f32 to vector<8x1xf32>
    %215 = arith.divf %213, %214 : vector<8x1xf32>
    %216 = vector.broadcast %215 : vector<8x1xf32> to vector<8x32xf32>
    %217 = arith.subf %211, %216 : vector<8x32xf32>
    %218 = vector.broadcast %215 : vector<8x1xf32> to vector<8x32xf32>
    %219 = arith.subf %211, %218 : vector<8x32xf32>
    %220 = arith.mulf %217, %219 : vector<8x32xf32>
    %cst_75 = arith.constant dense<0.000000e+00> : vector<8xf32>
    %221 = vector.multi_reduction <add>, %220, %cst_75 [1] : vector<8x32xf32> to vector<8xf32>
    %222 = vector.shape_cast %221 : vector<8xf32> to vector<8x1xf32>
    %cst_76 = arith.constant 3.200000e+01 : f32
    %223 = vector.broadcast %cst_76 : f32 to vector<8x1xf32>
    %224 = arith.divf %222, %223 : vector<8x1xf32>
    %225 = vector.broadcast %215 : vector<8x1xf32> to vector<8x32xf32>
    %226 = arith.subf %211, %225 : vector<8x32xf32>
    %cst_77 = arith.constant 9.99999974E-6 : f32
    %227 = vector.broadcast %cst_77 : f32 to vector<8x1xf32>
    %228 = arith.addf %224, %227 : vector<8x1xf32>
    %229 = math.rsqrt %228 : vector<8x1xf32>
    %230 = vector.broadcast %229 : vector<8x1xf32> to vector<8x32xf32>
    %231 = arith.mulf %226, %230 : vector<8x32xf32>
    %232 = vector.broadcast %144 : vector<1x32xf32> to vector<8x32xf32>
    %233 = arith.mulf %231, %232 : vector<8x32xf32>
    %234 = vector.broadcast %145 : vector<1x32xf32> to vector<8x32xf32>
    %235 = arith.addf %233, %234 : vector<8x32xf32>
    %236 = arith.truncf %235 : vector<8x32xf32> to vector<8x32xbf16>
    %c1_78 = arith.constant 1 : index
    %c0_79 = arith.constant 0 : index
    %c0_80 = arith.constant 0 : index
    %237 = vector.load %arg6[%c1_78, %c0_79, %c0_80] : memref<2x32x64xbf16, #tpu.memory_space<vmem>>, vector<1x32x64xbf16>
    %238 = vector.shape_cast %237 : vector<1x32x64xbf16> to vector<32x64xbf16>
    %cst_81 = arith.constant dense<0.000000e+00> : vector<8x64xf32>
    %239 = tpu.matmul %236, %238, %cst_81 {dimension_numbers = #tpu.dot_dimension_numbers<[1], [0], [0], [1], [0, 0, 1, 1], [], []>} : vector<8x32xbf16>, vector<32x64xbf16>, vector<8x64xf32> -> vector<8x64xf32>
    %c1_82 = arith.constant 1 : index
    %c0_83 = arith.constant 0 : index
    %c0_84 = arith.constant 0 : index
    %240 = vector.load %arg7[%c1_82, %c0_83, %c0_84] : memref<2x1x64xf32, #tpu.memory_space<vmem>>, vector<1x1x64xf32>
    %241 = vector.shape_cast %240 : vector<1x1x64xf32> to vector<1x64xf32>
    %242 = vector.broadcast %241 : vector<1x64xf32> to vector<8x64xf32>
    %243 = arith.addf %239, %242 : vector<8x64xf32>
    %cst_85 = arith.constant 0.000000e+00 : f32
    %244 = vector.broadcast %cst_85 : f32 to vector<8x64xf32>
    %245 = arith.maximumf %243, %244 : vector<8x64xf32>
    %246 = arith.truncf %245 : vector<8x64xf32> to vector<8x64xbf16>
    %c1_86 = arith.constant 1 : index
    %c0_87 = arith.constant 0 : index
    %c0_88 = arith.constant 0 : index
    %247 = vector.load %arg8[%c1_86, %c0_87, %c0_88] : memref<2x64x32xbf16, #tpu.memory_space<vmem>>, vector<1x64x32xbf16>
    %248 = vector.shape_cast %247 : vector<1x64x32xbf16> to vector<64x32xbf16>
    %cst_89 = arith.constant dense<0.000000e+00> : vector<8x32xf32>
    %249 = tpu.matmul %246, %248, %cst_89 {dimension_numbers = #tpu.dot_dimension_numbers<[1], [0], [0], [1], [0, 0, 1, 1], [], []>} : vector<8x64xbf16>, vector<64x32xbf16>, vector<8x32xf32> -> vector<8x32xf32>
    %250 = vector.broadcast %143 : vector<1x32xf32> to vector<8x32xf32>
    %251 = arith.addf %249, %250 : vector<8x32xf32>
    %252 = arith.addf %235, %251 : vector<8x32xf32>
    %cst_90 = arith.constant dense<0.000000e+00> : vector<8xf32>
    %253 = vector.multi_reduction <add>, %252, %cst_90 [1] : vector<8x32xf32> to vector<8xf32>
    %254 = vector.shape_cast %253 : vector<8xf32> to vector<8x1xf32>
    %cst_91 = arith.constant 3.200000e+01 : f32
    %255 = vector.broadcast %cst_91 : f32 to vector<8x1xf32>
    %256 = arith.divf %254, %255 : vector<8x1xf32>
    %257 = vector.broadcast %256 : vector<8x1xf32> to vector<8x32xf32>
    %258 = arith.subf %252, %257 : vector<8x32xf32>
    %259 = vector.broadcast %256 : vector<8x1xf32> to vector<8x32xf32>
    %260 = arith.subf %252, %259 : vector<8x32xf32>
    %261 = arith.mulf %258, %260 : vector<8x32xf32>
    %cst_92 = arith.constant dense<0.000000e+00> : vector<8xf32>
    %262 = vector.multi_reduction <add>, %261, %cst_92 [1] : vector<8x32xf32> to vector<8xf32>
    %263 = vector.shape_cast %262 : vector<8xf32> to vector<8x1xf32>
    %cst_93 = arith.constant 3.200000e+01 : f32
    %264 = vector.broadcast %cst_93 : f32 to vector<8x1xf32>
    %265 = arith.divf %263, %264 : vector<8x1xf32>
    %266 = vector.broadcast %256 : vector<8x1xf32> to vector<8x32xf32>
    %267 = arith.subf %252, %266 : vector<8x32xf32>
    %cst_94 = arith.constant 9.99999974E-6 : f32
    %268 = vector.broadcast %cst_94 : f32 to vector<8x1xf32>
    %269 = arith.addf %265, %268 : vector<8x1xf32>
    %270 = math.rsqrt %269 : vector<8x1xf32>
    %271 = vector.broadcast %270 : vector<8x1xf32> to vector<8x32xf32>
    %272 = arith.mulf %267, %271 : vector<8x32xf32>
    %273 = vector.broadcast %146 : vector<1x32xf32> to vector<8x32xf32>
    %274 = arith.mulf %272, %273 : vector<8x32xf32>
    %275 = vector.broadcast %147 : vector<1x32xf32> to vector<8x32xf32>
    %276 = arith.addf %274, %275 : vector<8x32xf32>
    %277 = vector.shape_cast %276 : vector<8x32xf32> to vector<1x8x32xf32>
    %278 = vector.extract_strided_slice %277 {offsets = [0, 0, 0], sizes = [1, 1, 32], strides = [1, 1, 1]} : vector<1x8x32xf32> to vector<1x1x32xf32>
    %c0_95 = arith.constant 0 : index
    %c0_96 = arith.constant 0 : index
    %c0_97 = arith.constant 0 : index
    %279 = vector.load %arg10[%c0_95, %c0_96, %c0_97] : memref<1x1x32xf32, #tpu.memory_space<vmem>>, vector<1x1x32xf32>
    tpu.vector_store %arg10[%c0_95, %c0_96, %c0_97], %278 {strides = array<i32>} : memref<1x1x32xf32, #tpu.memory_space<vmem>>, vector<1x1x32xf32>,
    return
  }
  func.func @transform_0(%arg0: i32) -> (i32, i32, i32) {
    %c0_i32 = arith.constant 0 : i32
    %c0_i32_0 = arith.constant 0 : i32
    %c0_i32_1 = arith.constant 0 : i32
    return %arg0, %c0_i32, %c0_i32_0 : i32, i32, i32
  }
  func.func @transform_1(%arg0: i32) -> (i32, i32, i32) {
    %c0_i32 = arith.constant 0 : i32
    %c0_i32_0 = arith.constant 0 : i32
    %c0_i32_1 = arith.constant 0 : i32
    return %arg0, %c0_i32, %c0_i32_0 : i32, i32, i32
  }
  func.func @transform_2(%arg0: i32) -> (i32, i32, i32) {
    %c0_i32 = arith.constant 0 : i32
    %c0_i32_0 = arith.constant 0 : i32
    %c0_i32_1 = arith.constant 0 : i32
    %c0_i32_2 = arith.constant 0 : i32
    return %c0_i32, %c0_i32_0, %c0_i32_1 : i32, i32, i32
  }
  func.func @transform_3(%arg0: i32) -> (i32, i32, i32) {
    %c0_i32 = arith.constant 0 : i32
    %c0_i32_0 = arith.constant 0 : i32
    %c0_i32_1 = arith.constant 0 : i32
    %c0_i32_2 = arith.constant 0 : i32
    return %c0_i32, %c0_i32_0, %c0_i32_1 : i32, i32, i32
  }
  func.func @transform_4(%arg0: i32) -> (i32, i32, i32) {
    %c0_i32 = arith.constant 0 : i32
    %c0_i32_0 = arith.constant 0 : i32
    %c0_i32_1 = arith.constant 0 : i32
    %c0_i32_2 = arith.constant 0 : i32
    return %c0_i32, %c0_i32_0, %c0_i32_1 : i32, i32, i32
  }
  func.func @transform_5(%arg0: i32) -> (i32, i32, i32) {
    %c0_i32 = arith.constant 0 : i32
    %c0_i32_0 = arith.constant 0 : i32
    %c0_i32_1 = arith.constant 0 : i32
    %c0_i32_2 = arith.constant 0 : i32
    return %c0_i32, %c0_i32_0, %c0_i32_1 : i32, i32, i32
  }
  func.func @transform_6(%arg0: i32) -> (i32, i32, i32) {
    %c0_i32 = arith.constant 0 : i32
    %c0_i32_0 = arith.constant 0 : i32
    %c0_i32_1 = arith.constant 0 : i32
    %c0_i32_2 = arith.constant 0 : i32
    return %c0_i32, %c0_i32_0, %c0_i32_1 : i32, i32, i32
  }
  func.func @transform_7(%arg0: i32) -> (i32, i32, i32) {
    %c0_i32 = arith.constant 0 : i32
    %c0_i32_0 = arith.constant 0 : i32
    %c0_i32_1 = arith.constant 0 : i32
    %c0_i32_2 = arith.constant 0 : i32
    return %c0_i32, %c0_i32_0, %c0_i32_1 : i32, i32, i32
  }
  func.func @transform_8(%arg0: i32) -> (i32, i32, i32) {
    %c0_i32 = arith.constant 0 : i32
    %c0_i32_0 = arith.constant 0 : i32
    %c0_i32_1 = arith.constant 0 : i32
    %c0_i32_2 = arith.constant 0 : i32
    return %c0_i32, %c0_i32_0, %c0_i32_1 : i32, i32, i32
  }
  func.func @transform_9(%arg0: i32) -> (i32, i32, i32) {
    %c0_i32 = arith.constant 0 : i32
    %c0_i32_0 = arith.constant 0 : i32
    %c0_i32_1 = arith.constant 0 : i32
    return %arg0, %c0_i32, %c0_i32_0 : i32, i32, i32
  }
}

</mosaic_0001>

<bundles_post_ra>
// kernel: tpu_custom_call.1
= control target key start
LH: loop header
LB: loop body
LE: loop exit
PB: predicated region body
PF: predicated region fallthrough
CT: control target
= control target key end

     0   :  { %14 = vsyncpa [#allocation3], 0  ;;  %s2369_s0 = inlined_call_operand.vmem [shape: f32[2,8,32], index: 0, kind: input, shape index: {}]   ;;  %s2370_s1 = inlined_call_operand.vmem [shape: f32[2,1,8], index: 1, kind: input, shape index: {}]   ;;  %s2371_s2 = inlined_call_operand.vmem [shape: bf16[2,32,96], index: 2, kind: input, shape index: {}]   ;;  %s2372_s3 = inlined_call_operand.vmem [shape: f32[2,1,96], index: 3, kind: input, shape index: {}]   ;;  %s2373_s4 = inlined_call_operand.vmem [shape: bf16[2,32,32], index: 4, kind: input, shape index: {}]   ;;  %s2374_s5 = inlined_call_operand.vmem [shape: bf16[2,32,64], index: 5, kind: input, shape index: {}]   ;;  %s2375_s6 = inlined_call_operand.vmem [shape: f32[2,1,64], index: 6, kind: input, shape index: {}]   ;;  %s2376_s7 = inlined_call_operand.vmem [shape: bf16[2,64,32], index: 7, kind: input, shape index: {}]   ;;  %s2377_s8 = inlined_call_operand.vmem [shape: f32[2,6,32], index: 8, kind: input, shape index: {}]   ;;  %s2378_s9 = inlined_call_operand.hbm [shape: f32[2,1,32], index: 9, kind: output, shape index: {}]  }
   0x1   :  { %16 = vsyncpa [#allocation3 + $0x1], 0  ;;  %s2006_s30 = smov 0   ;;  %s2008_s10 = smov 0  }
   0x2   :  { %s2010_s11 = smov 0   ;;  %s2012_s12 = smov 0  }
   0x3 LB: > { %s2027_s13 = sadd.s32 4294967295, %s1945_s12   ;;  %s1556_s14 = sadd.s32 4294967294, %s1945_s12   ;;  %s1945_s12 = sphi %s2012_s12, %s2388_s12   ;;  %s1941_s11 = sphi %s2010_s11, %s2387_s11   ;;  %s1937_s10 = sphi %s2008_s10, %s2386_s10   ;;  %s1933_s30 = sphi %s2006_s30, %s2385_s30  }
   0x4   : > { %s2031_s15 = sadd.s32 1, %s1945_s12   ;;  %s228_s16 = sadd.s32 1, %s1941_s11 }
   0x5   : > { %s225_s17 = ssub.s32 %s1945_s12, %s2031_s15  ;;  %p238_p0 = scmp.ne.s32.totalorder %s1941_s11, %s1937_s10 }
   0x6   : > { %p226_p1 = scmp.eq.s32.totalorder %s225_s17, 0  ;;  %p239_p2 = scmp.eq.s32.totalorder %s2027_s13, 1 }
   0x7   : > { %p244_p3 = scmp.ne.s32.totalorder %s1937_s10, %s1933_s30  ;;  %p245_p4 = scmp.eq.s32.totalorder %s1556_s14, 1 }
   0x8   : > { %s2042_s18 = scalar_select %p226_p1, %s1941_s11, %s228_s16  }
   0x9   : > { %p2044_p5 = por %p239_p2, %p238_p0  ;;  %p2048_p6 = por %p245_p4, %p244_p3 }
   0xa   : > { %p1559_p7 = scmp.ge.s32.totalorder %s1945_s12, 1  ;;  %p297_p8 = scmp.lt.s32.totalorder %s1945_s12, 3 }
   0xc   : > { %p298_p9 = pnand %p1559_p7, %p297_p8 }
   0xd   : > { %v1839_v0 = vld [vmem:[%s2371_s2] sm:$0xff] (!%p298_p9)   ;;  %v1947_v1 = vmov (!%p298_p9), 0.0   ;;  %v1840_v2 = vld [vmem:[%s2371_s2 + $0x8] sm:$0xff] (!%p298_p9)   ;;  %vm1948_vm0 = vmmov (!%p298_p9), 0   ;;  %p334_p10 = scmp.lt.s32.totalorder (!%p298_p9), %s2027_s13, 1  ;;  %vm369_vm1 = vcmask (!%p298_p9), 261120  }
   0xe   : > { %301 = sbr.rel (%p298_p9) target bundleno = 5018 (0x139a), region = 56  ;;  %1672 = vmatprep.subr.bf16.mxu1 (!%p298_p9), %v1947_v1  ;;  %1686 = vmatprep.subr.bf16.mxu0 (!%p298_p9), %v1947_v1  ;;  %v1561_v5 = vld [vmem:[%s2372_s3] ss:$0 sm:$0xff] (!%p298_p9)  ;;  %s1949_s17 = smov (!%p298_p9), 112   ;;  %vm417_vm2 = vcmask (!%p298_p9), 130048   ;;  %vm472_vm3 = vcmask (!%p298_p9), 64512  }
   0xf   : > { %1673 = vmatpush3.bf16.msra.mxu1 (!%p298_p9), %v1839_v0  ;;  %1676 = vmatprep.mubr.msk.bf16.mxu1 (!%p298_p9), %vm1948_vm0, %v1947_v1  ;;  %s1950_s21 = smov (!%p298_p9), 96   ;;  %s1951_s22 = smov (!%p298_p9), 80   ;;  %vm490_vm4 = vcmask (!%p298_p9), 1043456   ;;  %v1841_v54 = vld [vmem:[%s2373_s4] sm:$0xff] (!%p298_p9)   ;;  %v1842_v55 = vld [vmem:[%s2373_s4 + $0x8] sm:$0xff] (!%p298_p9)   ;;  %vm845_vm5 = vcmask (!%p298_p9), 523264  }
  0x10   : > { %1674 = vmatprep.subr.bf16.mxu1 (!%p298_p9), %v1947_v1  ;;  %1688 = vmatprep.mubr.msk.bf16.mxu0 (!%p298_p9), %vm1948_vm0, %v1947_v1  ;;  %s2380_s27 = smov (!%p298_p9), 48   ;;  %s2379_s23 = smov (!%p298_p9), 16   ;;  %vm1477_vm6 = vcmask (!%p298_p9), 253952  }
  0x11   : > { %s2384_s16 = smov (!%p298_p9), 16   ;;  %s332_s28 = sand.u32 (!%p298_p9), 1, %s1937_s10  }
  0x13   : > { %1675 = vmatpush3.bf16.msra.mxu1 (!%p298_p9), %v1840_v2 }
  0x14   : > { %1680 = vmatprep.subr.bf16.mxu1 (!%p298_p9), %v1947_v1 }
  0x15   : > { %s2069_s25 = scalar_select %p334_p10, %s2027_s13, 1 }
  0x17   : > { %s1560_s26 = sshll.u32 %s2069_s25, 3 }
  0x18   : > { %s337_s29 = scalar_lea.vmem %s2369_s0, %s1560_s26  ;;  %s340_s26 = scalar_lea.vmem %s2370_s1, %s2069_s25 }
  0x19   : > { %v2076_v3 = vld [vmem:[%s337_s29] sm:$0xff]  ;;  %s1952_s25 = smov 64   ;;  %s1625_s29 = sshll.u32 %s2027_s13, 4 }
  0x1a   : > { %v345_v4 = vpack.c.bf16 %v2076_v3, %v2076_v3  ;;  %v2103_v18 = vld [vmem:[%s340_s26] ss:$0 sm:$0xff]  ;;  %s2327_s14 = scalar_lea.hbm %s2378_s9, %s1625_s29  ;;  %s1955_s13 = smov [#allocation2]  }
  0x1b   : > { %s1887_s26 = sshll.u32 %s1955_s13, 4  ;;  %s1888_s26 = int_to_ptr.vmem [resolvable:$false] %s1887_s26 }
  0x1c   : > { %1677 = vmatmul.mubr.msk.bf16.vlgmr.msra.gmra.mrb[0].mxu1 %vm369_vm1, %v345_v4 }
  0x1d   : > { %1682 = vmatprep.mubr.msk.bf16.mxu1 %vm1948_vm0, %v1947_v1 }
  0xef   : > { %v407_v6 = vpop.f32.mrb[0].mxu1 }
  0xf0   : > { %v408_v7 = vadd.f32 %v1561_v5, %v407_v6  ;;  %v1678_v8 = vpop.f32.mrb[1].mxu1  ;;  %v656_v5 = vlaneseq }
  0xf1   : > { %v410_v9 = vpop.f32.mrb[2].mxu1  ;;  %v2142_v8 = vld [vmem:[%s2377_s8] sm:$0x3f] }
  0xf2   : > { %v413_v10 = vpack.c.bf16 %v408_v7, %v408_v7  ;;  %v1679_v11 = vpop.f32.mrb[3].mxu1  ;;  %v2136_v6 = vshrl.u32 %v656_v5, 7 }
  0xf4   : > { %534 = vrot.lane.b32.xlu1 %v413_v10, %s1949_s17  ;;  %415 = vrot.lane.b32.xlu0 %v413_v10, %s1950_s21  ;;  %v658_v7 = vsub.s32 0, %v2136_v6  ;;  %v905_v5 = vsub.s32 4, %v2136_v6 }
  0xf6   : > { %v659_v9 = vrot.slane %v2142_v8, %v658_v7 }
  0xf8   : > { %536 = vrot.lane.b32.xlu0 %v413_v10, %s1951_s22 }
 0x166   : > { %v416_v12 = vpop.permute.xlu0 %415  ;;  %v535_v16 = vpop.permute.xlu1 %534 }
 0x167   : > { %v422_v13 = vsel %vm417_vm2, %v416_v12, 0 }
 0x168   : > { %1681 = vmatpush3.bf16.xpose.msra.mxu1 %v422_v13 }
 0x169   : > { %1692 = vmatprep.subr.bf16.mxu1 %v1947_v1 }
 0x16a   : > { %v537_v14 = vpop.permute.xlu0 %536 }
 0x16b   : > { %v542_v15 = vsel %vm417_vm2, %v537_v14, 0 }
 0x16f   : > { %1683 = vmatmul.mubr.msk.bf16.vlgmr.msra.gmra.mrb[4].mxu1 %vm417_vm2, %v413_v10 }
 0x170   : > { %1693 = vmatpush3.bf16.xpose.msra.mxu1 %v542_v15  ;;  %1694 = vmatprep.mubr.msk.bf16.mxu1 %vm1948_vm0, %v1947_v1 }
 0x171   : > { %1704 = vmatprep.subr.bf16.mxu1 %v1947_v1 }
 0x177   : > { %1695 = vmatmul.mubr.msk.bf16.vlgmr.msra.gmra.mrb[8].mxu1 %vm417_vm2, %v535_v16 }
 0x178   : > { %1708 = vmatprep.mubr.msk.bf16.mxu1 %vm1948_vm0, %v1947_v1  ;;  %1705 = vmatpush3.bf16.msra.mxu1 %v1841_v54 }
 0x179   : > { %1706 = vmatprep.subr.bf16.mxu1 %v1947_v1 }
 0x17c   : > { %1707 = vmatpush3.bf16.msra.mxu1 %v1842_v55 }
 0x17d   : > { %1720 = vmatprep.subr.bf16.mxu1 %v1947_v1 }
 0x242   : > { %v458_v17 = vpop.f32.mrb[4].mxu1 }
 0x243   : > { %v464_v19 = vmul.f32 0.25, %v458_v17  ;;  %v1684_v20 = vpop.f32.mrb[5].mxu1 }
 0x244   : > { %v461_v21 = vpop.f32.mrb[6].mxu1 }
 0x245   : > { %v1685_v22 = vpop.f32.mrb[7].mxu1  ;;  %v471_v23 = vadd.f32 %v2103_v18, %v464_v19 }
 0x247   : > { %v473_v24 = vsel %vm472_vm3, %v471_v23, -inf }
 0x248   : > { %474 = vmax.xlane.f32.xlu1 %v473_v24  ;;  %v1844_v24 = vld [vmem:[%s2374_s5 + $0x8] sm:$0xff]  }
 0x24a   : > { %v578_v25 = vpop.f32.mrb[8].mxu1 }
 0x24b   : > { %v584_v26 = vmul.f32 0.25, %v578_v25  ;;  %v1696_v27 = vpop.f32.mrb[9].mxu1  ;;  %v1846_v25 = vld [vmem:[%s2376_s7 + $0x8] sm:$0xff]  }
 0x24c   : > { %v581_v28 = vpop.f32.mrb[10].mxu1 }
 0x24d   : > { %v1697_v29 = vpop.f32.mrb[11].mxu1  ;;  %v585_v30 = vadd.f32 %v2103_v18, %v584_v26 }
 0x24e   : > { %v732_v29 = vsub.s32 2, %v2136_v6 }
 0x24f   : > { %v586_v31 = vsel %vm472_vm3, %v585_v30, -inf }
 0x250   : > { %587 = vmax.xlane.f32.xlu0 %v586_v31  ;;  %v733_v31 = vrot.slane %v2142_v8, %v732_v29 }
 0x2d5   : > { %v475_v32 = vpop.xlane.xlu1 %474 }
 0x2d6   : > { %v476_v33 = vsub.f32 %v471_v23, %v475_v32  ;;  %v1843_v23 = vld [vmem:[%s2374_s5] sm:$0xff]  }
 0x2d8   : > { %v477_v34 = vmul.f32 1.442695, %v476_v33 }
 0x2da   : > { %1859 = vpow2.f32 %v477_v34 }
 0x2dd   : > { %v588_v35 = vpop.xlane.xlu0 %587 }
 0x2de   : > { %v589_v36 = vsub.f32 %v585_v30, %v588_v35  ;;  %v737_v30 = vsub.s32 3, %v2136_v6 }
 0x2e0   : > { %v590_v37 = vmul.f32 1.442695, %v589_v36  ;;  %v738_v34 = vrot.slane %v2142_v8, %v737_v30 }
 0x2e2   : > { %1861 = vpow2.f32 %v590_v37 }
 0x2e4   : > { %v1860_v38 = vpop.eup %1859 }
 0x2e5   : > { %v479_v39 = vsel %vm472_vm3, %v1860_v38, 0.0 }
 0x2e6   : > { %480 = vadd.xlane.f32.xlu0 %v479_v39  ;;  %v1848_v39 = vld [vmem:[%s2376_s7 + $0x18] sm:$0xff]  }
 0x2ec   : > { %v1862_v40 = vpop.eup %1861 }
 0x2ed   : > { %v592_v41 = vsel %vm472_vm3, %v1862_v40, 0.0 }
 0x2ee   : > { %593 = vadd.xlane.f32.xlu1 %v592_v41 }
 0x2fc   : > { %485 = vrot.lane.b32.xlu0 %v413_v10, %s1952_s25 }
 0x2ff   : > { %598 = vrot.lane.b32.xlu1 %v413_v10, %s2380_s27  ;;  %s1889_s27 = scalar_lea.vmem %s1888_s26, 32 }
 0x373   : > { %v481_v42 = vpop.xlane.xlu0 %480 }
 0x374   : > { %1863 = vrcp.f32 %v481_v42 }
 0x377   : > { %v486_v43 = vpop.permute.xlu0 %485 }
 0x378   : > { %v492_v44 = vsel %vm490_vm4, %v486_v43, 0 }
 0x379   : > { %1687 = vmatpush3.bf16.msra.mxu0 %v492_v44 }
 0x37a   : > { %1698 = vmatprep.subr.bf16.mxu0 %v1947_v1 }
 0x37b   : > { %v594_v45 = vpop.xlane.xlu1 %593 }
 0x37c   : > { %1865 = vrcp.f32 %v594_v45 }
 0x37e   : > { %v1864_v46 = vpop.eup %1863 }
 0x37f   : > { %v483_v47 = vmul.f32 %v1864_v46, %v1860_v38  ;;  %v599_v48 = vpop.permute.xlu1 %598  ;;  %v1847_v38 = vld [vmem:[%s2376_s7 + $0x10] sm:$0xff]  }
 0x380   : > { %v604_v50 = vsel %vm490_vm4, %v599_v48, 0  ;;  %v819_v48 = vsub.s32 1, %v2136_v6 }
 0x381   : > { %v484_v49 = vpack.c.bf16 %v483_v47, %v483_v47 }
 0x383   : > { %1689 = vmatmul.mubr.msk.bf16.vlgmr.msra.gmra.mrb[0].mxu0 %vm472_vm3, %v484_v49  ;;  %v820_v49 = vrot.slane %v2142_v8, %v819_v48 }
 0x384   : > { %1699 = vmatpush3.bf16.msra.mxu0 %v604_v50  ;;  %1700 = vmatprep.mubr.msk.bf16.mxu0 %vm1948_vm0, %v1947_v1 }
 0x385   : > { %1712 = vmatprep.subr.bf16.mxu0 %v1947_v1 }
 0x386   : > { %v1866_v51 = vpop.eup %1865 }
 0x387   : > { %v596_v52 = vmul.f32 %v1866_v51, %v1862_v40  ;;  %v1573_v40 = vld [vmem:[%s2375_s6] ss:$0 sm:$0xff] }
 0x389   : > { %v597_v53 = vpack.c.bf16 %v596_v52, %v596_v52 }
 0x38b   : > { %1701 = vmatmul.mubr.msk.bf16.vlgmr.msra.gmra.mrb[4].mxu0 %vm472_vm3, %v597_v53 }
 0x38c   : > { %1716 = vmatprep.mubr.msk.bf16.mxu0 %vm1948_vm0, %v1947_v1  ;;  %1713 = vmatpush3.bf16.msra.mxu0 %v1843_v23 }
 0x38d   : > { %1714 = vmatprep.subr.bf16.mxu0 %v1947_v1 }
 0x390   : > { %1715 = vmatpush3.bf16.msra.mxu0 %v1844_v24 }
 0x391   : > { %1732 = vmatprep.subr.bf16.mxu0 %v1947_v1 }
 0x456   : > { %v528_v56 = vpop.f32.mrb[0].mxu0 }
 0x457   : > { %v1690_v57 = vpop.f32.mrb[1].mxu0 }
 0x458   : > { %v531_v58 = vpop.f32.mrb[2].mxu0 }
 0x459   : > { %v1691_v59 = vpop.f32.mrb[3].mxu0 }
 0x45e   : > { %v640_v60 = vpop.f32.mrb[4].mxu0 }
 0x45f   : > { %647 = vrot.lane.b32.xlu1 %v640_v60, %s2379_s23  ;;  %v1702_v61 = vpop.f32.mrb[5].mxu0 }
 0x460   : > { %v643_v62 = vpop.f32.mrb[6].mxu0 }
 0x461   : > { %v1703_v63 = vpop.f32.mrb[7].mxu0  ;;  %v1849_v62 = vld [vmem:[%s2371_s2 + $0x10] sm:$0xff]  }
 0x462   : > { %v1850_v63 = vld [vmem:[%s2371_s2 + $0x18] sm:$0xff]  }
 0x4d1   : > { %v648_v0 = vpop.permute.xlu1 %647 }
 0x4d2   : > { %v650_v2 = vsel %vm417_vm2, %v528_v56, %v648_v0 }
 0x4d3   : > { %v651_v4 = vpack.c.bf16 %v650_v2, %v650_v2 }
 0x4d5   : > { %1709 = vmatmul.mubr.msk.bf16.vlgmr.msra.gmra.mrb[12].mxu1 %vm369_vm1, %v651_v4 }
 0x4d6   : > { %1728 = vmatprep.mubr.msk.bf16.mxu1 %vm1948_vm0, %v1947_v1 }
 0x5a8   : > { %v709_v10 = vpop.f32.mrb[12].mxu1 }
 0x5a9   : > { %v710_v11 = vadd.f32 %v709_v10, %v659_v9  ;;  %v1710_v12 = vpop.f32.mrb[13].mxu1  ;;  %v910_v9 = vsub.s32 5, %v2136_v6  ;;  %v906_v10 = vrot.slane %v2142_v8, %v905_v5 }
 0x5aa   : > { %v712_v13 = vpop.f32.mrb[14].mxu1 }
 0x5ab   : > { %v1711_v14 = vpop.f32.mrb[15].mxu1  ;;  %v715_v15 = vadd.f32 %v710_v11, %v2076_v3  ;;  %v1845_v3 = vld [vmem:[%s2376_s7] sm:$0xff]   ;;  %v911_v13 = vrot.slane %v2142_v8, %v910_v9 }
 0x5ac   : > { %1721 = vmatpush3.bf16.msra.mxu1 %v1845_v3 }
 0x5ad   : > { %v716_v16 = vsel %vm369_vm1, %v715_v15, 0.0  ;;  %1722 = vmatprep.subr.bf16.mxu1 %v1947_v1 }
 0x5ae   : > { %717 = vadd.xlane.f32.xlu0 %v716_v16 }
 0x5b0   : > { %1723 = vmatpush3.bf16.msra.mxu1 %v1846_v25 }
 0x5b1   : > { %1724 = vmatprep.subr.bf16.mxu1 %v1947_v1 }
 0x5b4   : > { %1725 = vmatpush3.bf16.msra.mxu1 %v1847_v38 }
 0x5b5   : > { %1726 = vmatprep.subr.bf16.mxu1 %v1947_v1 }
 0x5b8   : > { %1727 = vmatpush3.bf16.msra.mxu1 %v1848_v39 }
 0x5b9   : > { %1746 = vmatprep.subr.bf16.mxu1 %v1947_v1 }
 0x63b   : > { %v718_v17 = vpop.xlane.xlu0 %717 }
 0x63c   : > { %v720_v19 = vmul.f32 0.03125, %v718_v17  ;;  %v1588_v17 = vld [vmem:[%s2372_s3 + $0x1] ss:$0 sm:$0xff] }
 0x63e   : > { %v721_v20 = vsub.f32 %v715_v15, %v720_v19 }
 0x640   : > { %v722_v21 = vmul.f32 %v721_v20, %v721_v20 }
 0x642   : > { %v723_v22 = vsel %vm369_vm1, %v722_v21, 0.0 }
 0x643   : > { %724 = vadd.xlane.f32.xlu1 %v723_v22 }
 0x6d0   : > { %v725_v26 = vpop.xlane.xlu1 %724 }
 0x6d1   : > { %v726_v27 = vmul.f32 0.03125, %v725_v26 }
 0x6d3   : > { %v727_v28 = vadd.f32 1e-05, %v726_v27 }
 0x6d5   : > { %1867 = vrsqrt.f32 %v727_v28 }
 0x6df   : > { %v1868_v32 = vpop.eup %1867 }
 0x6e0   : > { %v729_v33 = vmul.f32 %v1868_v32, %v721_v20 }
 0x6e2   : > { %v734_v35 = vmul.f32 %v733_v31, %v729_v33 }
 0x6e4   : > { %v739_v36 = vadd.f32 %v738_v34, %v734_v35 }
 0x6e6   : > { %v740_v37 = vpack.c.bf16 %v739_v36, %v739_v36 }
 0x6e8   : > { %1717 = vmatmul.mubr.msk.bf16.vlgmr.msra.gmra.mrb[8].mxu0 %vm369_vm1, %v740_v37 }
 0x6e9   : > { %1736 = vmatprep.mubr.msk.bf16.mxu0 %vm1948_vm0, %v1947_v1  ;;  %1733 = vmatpush3.bf16.msra.mxu0 %v1849_v62 }
 0x6ea   : > { %1734 = vmatprep.subr.bf16.mxu0 %v1947_v1 }
 0x6ed   : > { %1735 = vmatpush3.bf16.msra.mxu0 %v1850_v63 }
 0x6ee   : > { %1740 = vmatprep.subr.bf16.mxu0 %v1947_v1 }
 0x7bb   : > { %v801_v41 = vpop.f32.mrb[8].mxu0 }
 0x7bc   : > { %v802_v42 = vadd.f32 %v1573_v40, %v801_v41  ;;  %v1718_v43 = vpop.f32.mrb[9].mxu0 }
 0x7bd   : > { %v804_v44 = vpop.f32.mrb[10].mxu0 }
 0x7be   : > { %v807_v45 = vmax.f32 %v802_v42, 0.0  ;;  %v1719_v46 = vpop.f32.mrb[11].mxu0 }
 0x7c0   : > { %v808_v47 = vpack.c.bf16 %v807_v45, %v807_v45 }
 0x7c2   : > { %1729 = vmatmul.mubr.msk.bf16.vlgmr.msra.gmra.mrb[16].mxu1 %vm845_vm5, %v808_v47 }
 0x7c3   : > { %1748 = vmatprep.mubr.msk.bf16.mxu1 %vm1948_vm0, %v1947_v1 }
 0x895   : > { %v883_v50 = vpop.f32.mrb[16].mxu1 }
 0x896   : > { %v884_v51 = vadd.f32 %v883_v50, %v820_v49  ;;  %v1730_v52 = vpop.f32.mrb[17].mxu1 }
 0x897   : > { %v886_v53 = vpop.f32.mrb[18].mxu1 }
 0x898   : > { %v1731_v54 = vpop.f32.mrb[19].mxu1  ;;  %v889_v55 = vadd.f32 %v884_v51, %v739_v36 }
 0x89a   : > { %v890_v56 = vsel %vm369_vm1, %v889_v55, 0.0 }
 0x89b   : > { %891 = vadd.xlane.f32.xlu0 %v890_v56 }
 0x928   : > { %v892_v57 = vpop.xlane.xlu0 %891 }
 0x929   : > { %v893_v58 = vmul.f32 0.03125, %v892_v57 }
 0x92b   : > { %v894_v59 = vsub.f32 %v889_v55, %v893_v58 }
 0x92d   : > { %v895_v60 = vmul.f32 %v894_v59, %v894_v59 }
 0x92f   : > { %v896_v61 = vsel %vm369_vm1, %v895_v60, 0.0 }
 0x930   : > { %897 = vadd.xlane.f32.xlu0 %v896_v61 }
 0x9bd   : > { %v898_v0 = vpop.xlane.xlu0 %897 }
 0x9be   : > { %v899_v2 = vmul.f32 0.03125, %v898_v0 }
 0x9c0   : > { %v900_v4 = vadd.f32 1e-05, %v899_v2 }
 0x9c2   : > { %1869 = vrsqrt.f32 %v900_v4  ;;  %v1851_v4 = vld [vmem:[%s2373_s4 + $0x10] sm:$0xff]  }
 0x9cc   : > { %v1870_v11 = vpop.eup %1869 }
 0x9cd   : > { %v902_v12 = vmul.f32 %v1870_v11, %v894_v59 }
 0x9cf   : > { %v907_v14 = vmul.f32 %v906_v10, %v902_v12  ;;  %v1852_v10 = vld [vmem:[%s2373_s4 + $0x18] sm:$0xff]  }
 0x9d1   : > { %v2213_v15 = vadd.f32 %v911_v13, %v907_v14 }
 0x9d3   : > { %v915_v16 = vpack.c.bf16 %v2213_v15, %v2213_v15 }
 0x9d5   : > { %1737 = vmatmul.mubr.msk.bf16.vlgmr.msra.gmra.mrb[12].mxu0 %vm369_vm1, %v915_v16 }
 0x9d6   : > { %1742 = vmatprep.mubr.msk.bf16.mxu0 %vm1948_vm0, %v1947_v1 }
 0xaa8   : > { %v978_v19 = vpop.f32.mrb[12].mxu0 }
 0xaa9   : > { %v979_v20 = vadd.f32 %v1588_v17, %v978_v19  ;;  %v1738_v21 = vpop.f32.mrb[13].mxu0 }
 0xaaa   : > { %v981_v22 = vpop.f32.mrb[14].mxu0 }
 0xaab   : > { %v984_v8 = vpack.c.bf16 %v979_v20, %v979_v20  ;;  %v1739_v23 = vpop.f32.mrb[15].mxu0 }
 0xaac   : > { %v2270_v23 = vld [vmem:[%s2377_s8 + $0x8] sm:$0x3f] }
 0xaad   : > { %1098 = vrot.lane.b32.xlu0 %v984_v8, %s1951_s22  ;;  %986 = vrot.lane.b32.xlu1 %v984_v8, %s1950_s21 }
 0xab1   : > { %1096 = vrot.lane.b32.xlu1 %v984_v8, %s1949_s17  ;;  %s2383_s17 = smov 48  }
 0xb1f   : > { %v987_v24 = vpop.permute.xlu1 %986  ;;  %v1099_v25 = vpop.permute.xlu0 %1098 }
 0xb20   : > { %v992_v3 = vsel %vm417_vm2, %v987_v24, 0  ;;  %v1104_v26 = vsel %vm417_vm2, %v1099_v25, 0  ;;  %v1222_v24 = vrot.slane %v2270_v23, %v658_v7  ;;  %v1853_v7 = vld [vmem:[%s2374_s5 + $0x10] sm:$0xff]  }
 0xb21   : > { %1741 = vmatpush3.bf16.xpose.msra.mxu0 %v992_v3 }
 0xb22   : > { %1752 = vmatprep.subr.bf16.mxu0 %v1947_v1 }
 0xb23   : > { %v1097_v27 = vpop.permute.xlu1 %1096 }
 0xb28   : > { %1743 = vmatmul.mubr.msk.bf16.vlgmr.msra.gmra.mrb[16].mxu0 %vm417_vm2, %v984_v8 }
 0xb29   : > { %1753 = vmatpush3.bf16.xpose.msra.mxu0 %v1104_v26  ;;  %1754 = vmatprep.mubr.msk.bf16.mxu0 %vm1948_vm0, %v1947_v1 }
 0xb2a   : > { %1764 = vmatprep.subr.bf16.mxu0 %v1947_v1 }
 0xb30   : > { %1755 = vmatmul.mubr.msk.bf16.vlgmr.msra.gmra.mrb[20].mxu0 %vm417_vm2, %v1097_v27 }
 0xb31   : > { %1768 = vmatprep.mubr.msk.bf16.mxu0 %vm1948_vm0, %v1947_v1  ;;  %1765 = vmatpush3.bf16.msra.mxu0 %v1851_v4 }
 0xb32   : > { %1766 = vmatprep.subr.bf16.mxu0 %v1947_v1 }
 0xb35   : > { %1767 = vmatpush3.bf16.msra.mxu0 %v1852_v10 }
 0xb36   : > { %1780 = vmatprep.subr.bf16.mxu0 %v1947_v1 }
 0xbfb   : > { %v1028_v28 = vpop.f32.mrb[16].mxu0 }
 0xbfc   : > { %v1034_v31 = vmul.f32 0.25, %v1028_v28  ;;  %v1744_v32 = vpop.f32.mrb[17].mxu0 }
 0xbfd   : > { %v1031_v33 = vpop.f32.mrb[18].mxu0 }
 0xbfe   : > { %v1745_v34 = vpop.f32.mrb[19].mxu0  ;;  %v1035_v35 = vadd.f32 %v2103_v18, %v1034_v31 }
 0xc00   : > { %v1036_v36 = vsel %vm472_vm3, %v1035_v35, -inf }
 0xc01   : > { %1037 = vmax.xlane.f32.xlu1 %v1036_v36 }
 0xc03   : > { %v1140_v37 = vpop.f32.mrb[20].mxu0 }
 0xc04   : > { %v1146_v38 = vmul.f32 0.25, %v1140_v37  ;;  %v1756_v39 = vpop.f32.mrb[21].mxu0 }
 0xc05   : > { %v1143_v40 = vpop.f32.mrb[22].mxu0  ;;  %v1856_v39 = vld [vmem:[%s2376_s7 + $0x28] sm:$0xff]  }
 0xc06   : > { %v1757_v41 = vpop.f32.mrb[23].mxu0  ;;  %v1147_v42 = vadd.f32 %v2103_v18, %v1146_v38  ;;  %v1854_v38 = vld [vmem:[%s2374_s5 + $0x18] sm:$0xff]  }
 0xc08   : > { %v1148_v43 = vsel %vm472_vm3, %v1147_v42, -inf }
 0xc09   : > { %1149 = vmax.xlane.f32.xlu0 %v1148_v43  ;;  %v1295_v43 = vrot.slane %v2270_v23, %v732_v29  ;;  %v1858_v29 = vld [vmem:[%s2376_s7 + $0x38] sm:$0xff]  }
 0xc8e   : > { %v1038_v44 = vpop.xlane.xlu1 %1037 }
 0xc8f   : > { %v1039_v45 = vsub.f32 %v1035_v35, %v1038_v44 }
 0xc91   : > { %v1040_v46 = vmul.f32 1.442695, %v1039_v45 }
 0xc93   : > { %1871 = vpow2.f32 %v1040_v46  ;;  %v1300_v46 = vrot.slane %v2270_v23, %v737_v30  ;;  %v1608_v30 = vld [vmem:[%s2375_s6 + $0x1] ss:$0 sm:$0xff] }
 0xc96   : > { %v1150_v47 = vpop.xlane.xlu0 %1149 }
 0xc97   : > { %v1151_v49 = vsub.f32 %v1147_v42, %v1150_v47 }
 0xc99   : > { %v1152_v50 = vmul.f32 1.442695, %v1151_v49 }
 0xc9b   : > { %1873 = vpow2.f32 %v1152_v50 }
 0xc9d   : > { %v1872_v51 = vpop.eup %1871 }
 0xc9e   : > { %v1042_v52 = vsel %vm472_vm3, %v1872_v51, 0.0 }
 0xc9f   : > { %1043 = vadd.xlane.f32.xlu0 %v1042_v52 }
 0xca5   : > { %v1874_v53 = vpop.eup %1873 }
 0xca6   : > { %v1154_v54 = vsel %vm472_vm3, %v1874_v53, 0.0 }
 0xca7   : > { %1155 = vadd.xlane.f32.xlu1 %v1154_v54 }
 0xcb5   : > { %1048 = vrot.lane.b32.xlu0 %v984_v8, %s1952_s25 }
 0xcb8   : > { %1160 = vrot.lane.b32.xlu1 %v984_v8, %s2383_s17  ;;  %s333_s17 = scalar_lea.vmem [#allocation2], %s332_s28 }
 0xcb9   : > { %s1492_s21 = sshll.u32 %s333_s17, 4  ;;  %s2329_s21 = int_to_ptr.vmem [resolvable:$true] %s1492_s21 }
 0xcba   : > { %s1883_s24 = scalar_lea.vmem %s2329_s21, 16  ;;  %p1890_p0 = scmp.lt.s32.totalorder %s2329_s21, %s1888_s26 }
 0xcbb   : > { %p1884_p11 = scmp.ne.s32.totalorder %s2329_s21, %s1883_s24  ;;  %p1891_p1 = scmp.lt.s32.totalorder %s1889_s27, %s1883_s24 }
 0xcbd   : > { %p1885_p12 = pnand %p1884_p11, %p2044_p5  ;;  %p1892_p2 = por %p1891_p1, %p1890_p0 }
 0xcbf   : > { %p1886_p13 = pneg %p1885_p12 }
 0xcc1   : > { %p1893_p3 = pnand %p1892_p2, %p1886_p13 }
 0xd2c   : > { %v1044_v18 = vpop.xlane.xlu0 %1043 }
 0xd2d   : > { %1875 = vrcp.f32 %v1044_v18 }
 0xd30   : > { %v1049_v55 = vpop.permute.xlu0 %1048 }
 0xd31   : > { %v1054_v56 = vsel %vm490_vm4, %v1049_v55, 0 }
 0xd32   : > { %1747 = vmatpush3.bf16.msra.mxu1 %v1054_v56 }
 0xd33   : > { %1758 = vmatprep.subr.bf16.mxu1 %v1947_v1 }
 0xd34   : > { %v1156_v57 = vpop.xlane.xlu1 %1155 }
 0xd35   : > { %1877 = vrcp.f32 %v1156_v57 }
 0xd37   : > { %v1876_v58 = vpop.eup %1875 }
 0xd38   : > { %v1046_v59 = vmul.f32 %v1876_v58, %v1872_v51  ;;  %v1161_v60 = vpop.permute.xlu1 %1160  ;;  %v1857_v51 = vld [vmem:[%s2376_s7 + $0x30] sm:$0xff]  }
 0xd39   : > { %v1166_v62 = vsel %vm490_vm4, %v1161_v60, 0 }
 0xd3a   : > { %v1047_v61 = vpack.c.bf16 %v1046_v59, %v1046_v59 }
 0xd3c   : > { %1749 = vmatmul.mubr.msk.bf16.vlgmr.msra.gmra.mrb[20].mxu1 %vm472_vm3, %v1047_v61 }
 0xd3d   : > { %1759 = vmatpush3.bf16.msra.mxu1 %v1166_v62  ;;  %1760 = vmatprep.mubr.msk.bf16.mxu1 %vm1948_vm0, %v1947_v1 }
 0xd3e   : > { %1772 = vmatprep.subr.bf16.mxu1 %v1947_v1 }
 0xd3f   : > { %v1878_v63 = vpop.eup %1877 }
 0xd40   : > { %v1158_v0 = vmul.f32 %v1878_v63, %v1874_v53 }
 0xd42   : > { %v1159_v2 = vpack.c.bf16 %v1158_v0, %v1158_v0 }
 0xd44   : > { %1761 = vmatmul.mubr.msk.bf16.vlgmr.msra.gmra.mrb[24].mxu1 %vm472_vm3, %v1159_v2 }
 0xd45   : > { %1776 = vmatprep.mubr.msk.bf16.mxu1 %vm1948_vm0, %v1947_v1  ;;  %1773 = vmatpush3.bf16.msra.mxu1 %v1853_v7 }
 0xd46   : > { %1774 = vmatprep.subr.bf16.mxu1 %v1947_v1 }
 0xd49   : > { %1775 = vmatpush3.bf16.msra.mxu1 %v1854_v38 }
 0xe0f   : > { %v1090_v11 = vpop.f32.mrb[20].mxu1 }
 0xe10   : > { %v1750_v12 = vpop.f32.mrb[21].mxu1 }
 0xe11   : > { %v1093_v13 = vpop.f32.mrb[22].mxu1 }
 0xe12   : > { %v1751_v14 = vpop.f32.mrb[23].mxu1 }
 0xe17   : > { %v1202_v16 = vpop.f32.mrb[24].mxu1 }
 0xe18   : > { %1209 = vrot.lane.b32.xlu1 %v1202_v16, %s2384_s16  ;;  %v1762_v17 = vpop.f32.mrb[25].mxu1  ;;  %v1470_v16 = vrot.slane %v2270_v23, %v905_v5  ;;  %s1480_s16 = scalar_lea.sflag [#allocation3], %s332_s28 }
 0xe19   : > { %v1205_v19 = vpop.f32.mrb[26].mxu1 }
 0xe1a   : > { %v1763_v20 = vpop.f32.mrb[27].mxu1 }
 0xe1b   : > { %v1475_v20 = vrot.slane %v2270_v23, %v910_v9 }
 0xe8a   : > { %v1210_v21 = vpop.permute.xlu1 %1209 }
 0xe8b   : > { %v1212_v22 = vsel %vm417_vm2, %v1090_v11, %v1210_v21 }
 0xe8c   : > { %v1213_v8 = vpack.c.bf16 %v1212_v22, %v1212_v22 }
 0xe8e   : > { %1769 = vmatmul.mubr.msk.bf16.vlgmr.msra.gmra.mrb[24].mxu0 %vm369_vm1, %v1213_v8 }
 0xe8f   : > { %1788 = vmatprep.mubr.msk.bf16.mxu0 %vm1948_vm0, %v1947_v1 }
 0xf61   : > { %v1272_v3 = vpop.f32.mrb[24].mxu0 }
 0xf62   : > { %v1273_v25 = vadd.f32 %v1272_v3, %v1222_v24  ;;  %v1770_v26 = vpop.f32.mrb[25].mxu0 }
 0xf63   : > { %v1275_v27 = vpop.f32.mrb[26].mxu0 }
 0xf64   : > { %v1771_v28 = vpop.f32.mrb[27].mxu0  ;;  %v1278_v31 = vadd.f32 %v1273_v25, %v2213_v15  ;;  %v1855_v15 = vld [vmem:[%s2376_s7 + $0x20] sm:$0xff]  }
 0xf65   : > { %1781 = vmatpush3.bf16.msra.mxu0 %v1855_v15 }
 0xf66   : > { %v1279_v32 = vsel %vm369_vm1, %v1278_v31, 0.0  ;;  %1782 = vmatprep.subr.bf16.mxu0 %v1947_v1 }
 0xf67   : > { %1280 = vadd.xlane.f32.xlu0 %v1279_v32 }
 0xf69   : > { %1783 = vmatpush3.bf16.msra.mxu0 %v1856_v39 }
 0xf6a   : > { %1784 = vmatprep.subr.bf16.mxu0 %v1947_v1 }
 0xf6d   : > { %1785 = vmatpush3.bf16.msra.mxu0 %v1857_v51 }
 0xf6e   : > { %1786 = vmatprep.subr.bf16.mxu0 %v1947_v1  ;;  %v1385_v1 = vrot.slane %v2270_v23, %v819_v48 }
 0xf71   : > { %1787 = vmatpush3.bf16.msra.mxu0 %v1858_v29 }
 0xff4   : > { %v1281_v33 = vpop.xlane.xlu0 %1280 }
 0xff5   : > { %v1282_v34 = vmul.f32 0.03125, %v1281_v33 }
 0xff7   : > { %v1283_v35 = vsub.f32 %v1278_v31, %v1282_v34 }
 0xff9   : > { %v1284_v36 = vmul.f32 %v1283_v35, %v1283_v35 }
 0xffb   : > { %v1285_v37 = vsel %vm369_vm1, %v1284_v36, 0.0 }
 0xffc   : > { %1286 = vadd.xlane.f32.xlu1 %v1285_v37 }
0x1089   : > { %v1287_v40 = vpop.xlane.xlu1 %1286 }
0x108a   : > { %v1288_v41 = vmul.f32 0.03125, %v1287_v40 }
0x108c   : > { %v1289_v42 = vadd.f32 1e-05, %v1288_v41 }
0x108e   : > { %1879 = vrsqrt.f32 %v1289_v42 }
0x1098   : > { %v1880_v44 = vpop.eup %1879 }
0x1099   : > { %v1291_v45 = vmul.f32 %v1880_v44, %v1283_v35 }
0x109b   : > { %v1296_v47 = vmul.f32 %v1295_v43, %v1291_v45 }
0x109d   : > { %v1301_v49 = vadd.f32 %v1300_v46, %v1296_v47 }
0x109f   : > { %v1302_v50 = vpack.c.bf16 %v1301_v49, %v1301_v49 }
0x10a1   : > { %1777 = vmatmul.mubr.msk.bf16.vlgmr.msra.gmra.mrb[28].mxu1 %vm369_vm1, %v1302_v50 }
0x1174   : > { %v1365_v52 = vpop.f32.mrb[28].mxu1 }
0x1175   : > { %v1366_v53 = vadd.f32 %v1608_v30, %v1365_v52  ;;  %v1778_v54 = vpop.f32.mrb[29].mxu1 }
0x1176   : > { %v1368_v18 = vpop.f32.mrb[30].mxu1 }
0x1177   : > { %v1371_v55 = vmax.f32 %v1366_v53, 0.0  ;;  %v1779_v56 = vpop.f32.mrb[31].mxu1 }
0x1179   : > { %v1372_v57 = vpack.c.bf16 %v1371_v55, %v1371_v55 }
0x117b   : > { %1789 = vmatmul.mubr.msk.bf16.vlgmr.msra.gmra.mrb[28].mxu0 %vm845_vm5, %v1372_v57 }
0x124e   : > { %v1447_v58 = vpop.f32.mrb[28].mxu0 }
0x124f   : > { %v1448_v59 = vadd.f32 %v1447_v58, %v1385_v1  ;;  %v1790_v60 = vpop.f32.mrb[29].mxu0 }
0x1250   : > { %v1450_v61 = vpop.f32.mrb[30].mxu0 }
0x1251   : > { %v1791_v62 = vpop.f32.mrb[31].mxu0  ;;  %v1453_v63 = vadd.f32 %v1448_v59, %v1301_v49 }
0x1253   : > { %v1454_v0 = vsel %vm369_vm1, %v1453_v63, 0.0 }
0x1254   : > { %1455 = vadd.xlane.f32.xlu0 %v1454_v0 }
0x12e1   : > { %v1456_v2 = vpop.xlane.xlu0 %1455 }
0x12e2   : > { %v1457_v4 = vmul.f32 0.03125, %v1456_v2 }
0x12e4   : > { %v1458_v10 = vsub.f32 %v1453_v63, %v1457_v4 }
0x12e6   : > { %v1459_v11 = vmul.f32 %v1458_v10, %v1458_v10 }
0x12e8   : > { %v1460_v12 = vsel %vm369_vm1, %v1459_v11, 0.0 }
0x12e9   : > { %1461 = vadd.xlane.f32.xlu0 %v1460_v12 }
0x1376   : > { %v1462_v13 = vpop.xlane.xlu0 %1461 }
0x1377   : > { %v1463_v48 = vmul.f32 0.03125, %v1462_v13 }
0x1379   : > { %v1464_v14 = vadd.f32 1e-05, %v1463_v48 }
0x137b   : > { %1881 = vrsqrt.f32 %v1464_v14 }
0x1385   : > { %v1882_v17 = vpop.eup %1881 }
0x1386   : > { %v1466_v19 = vmul.f32 %v1882_v17, %v1458_v10 }
0x1388   : > { %v1471_v21 = vmul.f32 %v1470_v16, %v1466_v19 }
0x138a   : > { %v1476_v22 = vadd.f32 %v1475_v20, %v1471_v21 }
0x138c   : > { %1478 = vst.msk [vmem:[%s333_s17] sm:$0x1] %vm1477_vm6, %v1476_v22 }
0x138d   : > { %1896 = shalt.err (!%p1893_p3)
}
0x138e   : > { %s1897_s23 = scalar_lea.hbm %s2327_s14, 16  ;;  %s1901_s17 = scalar_lea.hbm %s2378_s9, 32 }
0x138f   : > { %p1898_p4 = scmp.ne.s32.totalorder %s2327_s14, %s1897_s23  ;;  %p1902_p9 = scmp.lt.u32.totalorder %s2327_s14, %s2378_s9 }
0x1390   : > { %p1903_p10 = scmp.lt.u32.totalorder %s1901_s17, %s1897_s23  ;;  %p1905_p12 = scmp.lt.u32.totalorder %s1897_s23, %s2327_s14 }
0x1391   : > { %p1899_p7 = pnand %p1898_p4, %p2044_p5 }
0x1392   : > { %p1904_p11 = por %p1903_p10, %p1902_p9 }
0x1393   : > { %p1900_p8 = pneg %p1899_p7 }
0x1394   : > { %p1906_p13 = por %p1905_p12, %p1904_p11 }
0x1396   : > { %p1907_p0 = pnand %p1906_p13, %p1900_p8 }
0x1398   : > { %1910 = shalt.err (!%p1907_p0)
}
0x1399   : > { %1792 = dma.vmem_to_hbm [thread:$0]  (%p2044_p5), %s2329_s21, 16, %s2327_s14, %s1480_s16  }
0x139a PF: > { %p1798_p1 = scmp.ge.s32.totalorder %s1945_s12, 2  ;;  %s1504_s24 = sand.u32 1, %s1933_s30  }
0x139b   : > { %s1505_s13 = scalar_lea.sflag [#allocation3], %s1504_s24 }
0x139c   : > { %p1795_p2 = pnand %p1798_p1, %p2048_p6 }
0x139e   : > { %1928 = dma.done.wait (!%p1795_p2), %s1505_s13, 16  }
0x139f   : > { %1930 = vsyncadd (!%p1795_p2), %s1505_s13, 4294967280  ;;  %p19_p3 = scmp.ge.s32.totalorder %s2031_s15, 4   ;;  %s2385_s30 = smov %s1937_s10 }
0x13a0   : > { %s2386_s10 = smov %s1941_s11  ;;  %s2387_s11 = smov %s2042_s18 }
0x13a1   : > { %s2388_s12 = smov %s2031_s15  ;;  %21 = sbr.rel (!%p19_p3) target bundleno = 3 (0x3), region = 101 }
0x13a8   :  { %1509 = vsyncpa [#allocation3], 1 }
0x13a9   :  { %1511 = vsyncpa [#allocation3 + $0x1], 1 }

</bundles_post_ra>
